<compile_context>
chip_gen: v5e
topology: v5e:2x2
jax: 0.10.0
libtpu: 0.0.40
codegen_flags: <defaults>
</compile_context>

<pallas_src>
import functools

import numpy as np
import jax
import jax.numpy as jnp
from jax.experimental import pallas as pl
from jax.experimental.pallas import tpu as pltpu

# ----------------------- model hyper-params (globals of the torch script) ------------------------
VOCABS_LEN = 10
EOS_INDEX = 1


# ------------------------------------ helpers ----------------------------------------------------
def _layernorm(z, g, b, eps=1e-5):
    mu = jnp.mean(z, axis=-1, keepdims=True)
    var = jnp.mean((z - mu) * (z - mu), axis=-1, keepdims=True)
    return (z - mu) * jax.lax.rsqrt(var + eps) * g + b


def make_pos_table(d_model, max_len=1024):
    # exact replication of PositionalEncoding.__init__ (computed once, at init)
    pos_table = np.array(
        [[pos / np.power(10000, 2 * i / d_model) for i in range(d_model)]
         if pos != 0 else np.zeros(d_model) for pos in range(max_len)])
    pos_table[1:, 0::2] = np.sin(pos_table[1:, 0::2])
    pos_table[1:, 1::2] = np.cos(pos_table[1:, 1::2])
    return jnp.asarray(pos_table, dtype=jnp.float32)


# ------------------------------------ fused Pallas kernel ----------------------------------------
def encoder_fused_kernel(vlen_ref,                                   # scalar-prefetch (SMEM)
                         x_ref, src_w_ref, src_b_ref, eos_ref, pos_ref,
                         wqkv_ref, wo_ref, ln1g_ref, ln1b_ref,
                         w1_ref, w2_ref, ln2g_ref, ln2b_ref,
                         y_ref, attn_ref,
                         *, n_layers, n_heads, d_k, d_v):
    b = pl.program_id(0)
    S = x_ref.shape[1]
    D = src_w_ref.shape[1]
    h_dk = n_heads * d_k

    # ---- embedding: src Linear + (dropout = identity) + EOS overwrite of last row + pos enc ----
    x_in = x_ref[0]                                                            # (S, d_input)
    emb = jnp.dot(x_in, src_w_ref[...], preferred_element_type=jnp.float32) + src_b_ref[...]
    y_ref[0] = emb + pos_ref[...]
    # pos_outputs[:, -1] = eos_embedding (same EOS vector for every batch), then pos is added
    y_ref[0, S - 1:S, :] = eos_ref[...] + pos_ref[S - 1:S, :]
    x = y_ref[0]                                                               # (S, D)

    # ---- pad mask built in-kernel from valid_lens (reproduces the torch in-place logic):
    #      masked[j] = (j < L_b) & (L_b > 1); True positions filled with -1e9 ----
    lv = vlen_ref[b]
    col = jax.lax.broadcasted_iota(jnp.int32, (S, S), 1)
    masked = jnp.logical_and(col < lv, lv > 1)

    inv_sqrt_dk = jnp.float32(1.0 / np.sqrt(float(d_k)))
    neg_inf = jnp.float32(-1e9)

    for l in range(n_layers):                                                  # static unroll
        wqkv = wqkv_ref[l]                                                     # (D, 2*H*dk + H*dv)
        wo = wo_ref[l]                                                         # (H*dv, D)

        # fused QKV projection: one matmul instead of three underfilled ones
        qkv = jnp.dot(x, wqkv, preferred_element_type=jnp.float32)             # (S, 2*H*dk+H*dv)

        acc = jnp.zeros((S, D), jnp.float32)
        for h in range(n_heads):                                               # static unroll
            qh = qkv[:, h * d_k:(h + 1) * d_k]
            kh = qkv[:, h_dk + h * d_k: h_dk + (h + 1) * d_k]
            vh = qkv[:, 2 * h_dk + h * d_v: 2 * h_dk + (h + 1) * d_v]

            # q @ k.T without materializing a transpose
            scores = jax.lax.dot_general(qh, kh, (((1,), (1,)), ((), ())),
                                         preferred_element_type=jnp.float32) * inv_sqrt_dk
            scores = jnp.where(masked, neg_inf, scores)
            m = jnp.max(scores, axis=-1, keepdims=True)
            e = jnp.exp(scores - m)
            attn = e * pl.reciprocal(jnp.sum(e, axis=-1, keepdims=True), approx=True)
            attn_ref[0, l, h] = attn

            # fold head concat into the output projection: acc += (attn @ v_h) @ Wo[h]
            ctx_h = jnp.dot(attn, vh, preferred_element_type=jnp.float32)      # (S, dv)
            acc = acc + jnp.dot(ctx_h, wo[h * d_v:(h + 1) * d_v, :],
                                preferred_element_type=jnp.float32)

        out = acc + x                                                          # residual
        y1 = _layernorm(out, ln1g_ref[l], ln1b_ref[l])

        # position-wise FFN + residual + layernorm
        h1 = jnp.maximum(jnp.dot(y1, w1_ref[l], preferred_element_type=jnp.float32), 0.0)
        h2 = jnp.dot(h1, w2_ref[l], preferred_element_type=jnp.float32)
        x = _layernorm(h2 + y1, ln2g_ref[l], ln2b_ref[l])

    y_ref[0] = x


# ------------------------------------ pallas_call wrapper ----------------------------------------
def encoder_forward(params, enc_inputs, valid_lens, *, d_k, d_v, n_heads):
    B, S, d_in = enc_inputs.shape
    D = params["src_w"].shape[1]
    n_layers = params["wqkv"].shape[0]
    d_ff = params["w1"].shape[2]
    qkv_width = n_heads * (2 * d_k + d_v)
    H = n_heads

    eos_vec = params["eos_table"][EOS_INDEX].reshape(1, D)                     # eos_emb(eos_index)
    pos = params["pos_table"][:S, :]                                           # (S, D)

    kern = functools.partial(encoder_fused_kernel, n_layers=n_layers,
                             n_heads=n_heads, d_k=d_k, d_v=d_v)

    full2 = lambda b, vl: (0, 0)
    full3 = lambda b, vl: (0, 0, 0)

    grid_spec = pltpu.PrefetchScalarGridSpec(
        num_scalar_prefetch=1,                                                 # valid_lens -> SMEM
        grid=(B,),
        in_specs=[
            pl.BlockSpec((1, S, d_in), lambda b, vl: (b, 0, 0)),               # enc_inputs
            pl.BlockSpec((d_in, D), full2),                                    # src_w
            pl.BlockSpec((1, D), full2),                                       # src_b
            pl.BlockSpec((1, D), full2),                                       # eos vector
            pl.BlockSpec((S, D), full2),                                       # pos table slice
            pl.BlockSpec((n_layers, D, qkv_width), full3),                     # fused Wqkv
            pl.BlockSpec((n_layers, H * d_v, D), full3),                       # Wo
            pl.BlockSpec((n_layers, 1, D), full3),                             # ln1 gamma
            pl.BlockSpec((n_layers, 1, D), full3),                             # ln1 beta
            pl.BlockSpec((n_layers, D, d_ff), full3),                          # W1
            pl.BlockSpec((n_layers, d_ff, D), full3),                          # W2
            pl.BlockSpec((n_layers, 1, D), full3),                             # ln2 gamma
            pl.BlockSpec((n_layers, 1, D), full3),                             # ln2 beta
        ],
        out_specs=(
            pl.BlockSpec((1, S, D), lambda b, vl: (b, 0, 0)),
            pl.BlockSpec((1, n_layers, H, S, S), lambda b, vl: (b, 0, 0, 0, 0)),
        ),
    )

    enc_outputs, attn_all = pl.pallas_call(
        kern,
        out_shape=(
            jax.ShapeDtypeStruct((B, S, D), jnp.float32),
            jax.ShapeDtypeStruct((B, n_layers, H, S, S), jnp.float32),
        ),
        grid_spec=grid_spec,
        compiler_params=pltpu.CompilerParams(dimension_semantics=("parallel",)),
    )(valid_lens.astype(jnp.int32), enc_inputs, params["src_w"], params["src_b"],
      eos_vec, pos,
      params["wqkv"], params["wo"], params["ln1_g"], params["ln1_b"],
      params["w1"], params["w2"], params["ln2_g"], params["ln2_b"])

    enc_self_attns = [attn_all[:, l] for l in range(n_layers)]                 # list of (B,H,S,S)
    return enc_outputs, enc_self_attns


# ------------------------------------ params ------------------------------------------------------
def init_encoder_params(key, d_input, d_model, d_ff, d_k, d_v, n_heads, n_layers):
    ks = jax.random.split(key, 7)
    s = 0.02
    qkv_width = n_heads * (2 * d_k + d_v)
    return {
        "eos_table": s * jax.random.normal(ks[0], (VOCABS_LEN, d_model), jnp.float32),
        "src_w": s * jax.random.normal(ks[1], (d_input, d_model), jnp.float32),
        "src_b": s * jax.random.normal(ks[2], (1, d_model), jnp.float32),
        # per-layer weights stacked along a leading layer axis, Wq|Wk|Wv fused:
        "wqkv": s * jax.random.normal(ks[3], (n_layers, d_model, qkv_width), jnp.float32),
        "wo": s * jax.random.normal(ks[4], (n_layers, n_heads * d_v, d_model), jnp.float32),
        "ln1_g": jnp.ones((n_layers, 1, d_model), jnp.float32),
        "ln1_b": jnp.zeros((n_layers, 1, d_model), jnp.float32),
        "w1": s * jax.random.normal(ks[5], (n_layers, d_model, d_ff), jnp.float32),
        "w2": s * jax.random.normal(ks[6], (n_layers, d_ff, d_model), jnp.float32),
        "ln2_g": jnp.ones((n_layers, 1, d_model), jnp.float32),
        "ln2_b": jnp.zeros((n_layers, 1, d_model), jnp.float32),
        "pos_table": make_pos_table(d_model),                                  # hoisted out of forward
    }


# ------------------------------------------ main --------------------------------------------------
if __name__ == "__main__":
    B, S = 2, 8
    d_input, d_model, d_ff = 16, 32, 64
    d_k = d_v = 8
    n_heads, n_layers = 4, 2

    key = jax.random.PRNGKey(0)
    k_in, k_par = jax.random.split(key)
    enc_inputs = jax.random.normal(k_in, (B, S, d_input), jnp.float32)
    valid_lens = jnp.array([5, 8], dtype=jnp.int32)

    params = init_encoder_params(k_par, d_input, d_model, d_ff, d_k, d_v, n_heads, n_layers)

    enc_outputs, enc_self_attns = encoder_forward(
        params, enc_inputs, valid_lens, d_k=d_k, d_v=d_v, n_heads=n_heads)
    jax.block_until_ready(enc_outputs)
    for a in enc_self_attns:
        jax.block_until_ready(a)

    assert enc_outputs.shape == (B, S, d_model)
    assert all(a.shape == (B, n_heads, S, S) for a in enc_self_attns)
    print("KERNEL_OK")
</pallas_src>

<mosaic_0001>
module attributes {stable_mosaic.version = 11 : i64} {
  func.func @encoder_fused_kernel(%arg0: i32, %arg1: memref<2xi32, #tpu.memory_space<smem>>, %arg2: memref<1x8x16xf32, #tpu.memory_space<vmem>>, %arg3: memref<16x32xf32, #tpu.memory_space<vmem>>, %arg4: memref<1x32xf32, #tpu.memory_space<vmem>>, %arg5: memref<1x32xf32, #tpu.memory_space<vmem>>, %arg6: memref<8x32xf32, #tpu.memory_space<vmem>>, %arg7: memref<2x32x96xf32, #tpu.memory_space<vmem>>, %arg8: memref<2x32x32xf32, #tpu.memory_space<vmem>>, %arg9: memref<2x1x32xf32, #tpu.memory_space<vmem>>, %arg10: memref<2x1x32xf32, #tpu.memory_space<vmem>>, %arg11: memref<2x32x64xf32, #tpu.memory_space<vmem>>, %arg12: memref<2x64x32xf32, #tpu.memory_space<vmem>>, %arg13: memref<2x1x32xf32, #tpu.memory_space<vmem>>, %arg14: memref<2x1x32xf32, #tpu.memory_space<vmem>>, %arg15: memref<1x8x32xf32, #tpu.memory_space<vmem>>, %arg16: memref<1x2x4x8x8xf32, #tpu.memory_space<vmem>>) attributes {dimension_semantics = [#tpu.dimension_semantics<parallel>], iteration_bounds = array<i64: 2>, scalar_prefetch = 1 : i64, scratch_operands = 0 : i64, tpu.core_type = #tpu.core_type<tc>, window_params = [{transform_indices = @transform_0, window_bounds = array<i64: 1, 8, 16>}, {pipeline_mode = #tpu.pipeline_mode<synchronous>, transform_indices = @transform_1, window_bounds = array<i64: 16, 32>}, {pipeline_mode = #tpu.pipeline_mode<synchronous>, transform_indices = @transform_2, window_bounds = array<i64: 1, 32>}, {pipeline_mode = #tpu.pipeline_mode<synchronous>, transform_indices = @transform_3, window_bounds = array<i64: 1, 32>}, {pipeline_mode = #tpu.pipeline_mode<synchronous>, transform_indices = @transform_4, window_bounds = array<i64: 8, 32>}, {pipeline_mode = #tpu.pipeline_mode<synchronous>, transform_indices = @transform_5, window_bounds = array<i64: 2, 32, 96>}, {pipeline_mode = #tpu.pipeline_mode<synchronous>, transform_indices = @transform_6, window_bounds = array<i64: 2, 32, 32>}, {pipeline_mode = #tpu.pipeline_mode<synchronous>, transform_indices = @transform_7, window_bounds = array<i64: 2, 1, 32>}, {pipeline_mode = #tpu.pipeline_mode<synchronous>, transform_indices = @transform_8, window_bounds = array<i64: 2, 1, 32>}, {pipeline_mode = #tpu.pipeline_mode<synchronous>, transform_indices = @transform_9, window_bounds = array<i64: 2, 32, 64>}, {pipeline_mode = #tpu.pipeline_mode<synchronous>, transform_indices = @transform_10, window_bounds = array<i64: 2, 64, 32>}, {pipeline_mode = #tpu.pipeline_mode<synchronous>, transform_indices = @transform_11, window_bounds = array<i64: 2, 1, 32>}, {pipeline_mode = #tpu.pipeline_mode<synchronous>, transform_indices = @transform_12, window_bounds = array<i64: 2, 1, 32>}, {transform_indices = @transform_13, window_bounds = array<i64: 1, 8, 32>}, {transform_indices = @transform_14, window_bounds = array<i64: 1, 2, 4, 8, 8>}]} {
    %c0 = arith.constant 0 : index
    %c0_0 = arith.constant 0 : index
    %c0_1 = arith.constant 0 : index
    %0 = vector.load %arg2[%c0, %c0_0, %c0_1] : memref<1x8x16xf32, #tpu.memory_space<vmem>>, vector<1x8x16xf32>
    %1 = vector.shape_cast %0 : vector<1x8x16xf32> to vector<8x16xf32>
    %c0_2 = arith.constant 0 : index
    %c0_3 = arith.constant 0 : index
    %2 = vector.load %arg3[%c0_2, %c0_3] : memref<16x32xf32, #tpu.memory_space<vmem>>, vector<16x32xf32>
    %cst = arith.constant dense<0.000000e+00> : vector<8x32xf32>
    %3 = tpu.matmul %1, %2, %cst {dimension_numbers = #tpu.dot_dimension_numbers<[1], [0], [0], [1], [0, 0, 1, 1], [], []>} : vector<8x16xf32>, vector<16x32xf32>, vector<8x32xf32> -> vector<8x32xf32>
    %c0_4 = arith.constant 0 : index
    %c0_5 = arith.constant 0 : index
    %4 = vector.load %arg4[%c0_4, %c0_5] : memref<1x32xf32, #tpu.memory_space<vmem>>, vector<1x32xf32>
    %5 = vector.broadcast %4 : vector<1x32xf32> to vector<8x32xf32>
    %6 = arith.addf %3, %5 : vector<8x32xf32>
    %c0_6 = arith.constant 0 : index
    %c0_7 = arith.constant 0 : index
    %7 = vector.load %arg6[%c0_6, %c0_7] : memref<8x32xf32, #tpu.memory_space<vmem>>, vector<8x32xf32>
    %8 = arith.addf %6, %7 : vector<8x32xf32>
    %c0_8 = arith.constant 0 : index
    %c0_9 = arith.constant 0 : index
    %c0_10 = arith.constant 0 : index
    %9 = vector.load %arg15[%c0_8, %c0_9, %c0_10] : memref<1x8x32xf32, #tpu.memory_space<vmem>>, vector<1x8x32xf32>
    %10 = vector.shape_cast %9 : vector<1x8x32xf32> to vector<8x32xf32>
    %11 = vector.shape_cast %8 : vector<8x32xf32> to vector<1x8x32xf32>
    tpu.vector_store %arg15[%c0_8, %c0_9, %c0_10], %11 {strides = array<i32>} : memref<1x8x32xf32, #tpu.memory_space<vmem>>, vector<1x8x32xf32>,
    %c0_11 = arith.constant 0 : index
    %c0_12 = arith.constant 0 : index
    %12 = vector.load %arg5[%c0_11, %c0_12] : memref<1x32xf32, #tpu.memory_space<vmem>>, vector<1x32xf32>
    %c7 = arith.constant 7 : index
    %c0_13 = arith.constant 0 : index
    %13 = vector.load %arg6[%c7, %c0_13] : memref<8x32xf32, #tpu.memory_space<vmem>>, vector<1x32xf32>
    %14 = arith.addf %12, %13 : vector<1x32xf32>
    %c0_14 = arith.constant 0 : index
    %c7_15 = arith.constant 7 : index
    %c0_16 = arith.constant 0 : index
    %15 = vector.load %arg15[%c0_14, %c7_15, %c0_16] : memref<1x8x32xf32, #tpu.memory_space<vmem>>, vector<1x1x32xf32>
    %16 = vector.shape_cast %15 : vector<1x1x32xf32> to vector<1x32xf32>
    %17 = vector.shape_cast %14 : vector<1x32xf32> to vector<1x1x32xf32>
    tpu.vector_store %arg15[%c0_14, %c7_15, %c0_16], %17 {strides = array<i32>} : memref<1x8x32xf32, #tpu.memory_space<vmem>>, vector<1x1x32xf32>,
    %c0_17 = arith.constant 0 : index
    %c0_18 = arith.constant 0 : index
    %c0_19 = arith.constant 0 : index
    %18 = vector.load %arg15[%c0_17, %c0_18, %c0_19] : memref<1x8x32xf32, #tpu.memory_space<vmem>>, vector<1x8x32xf32>
    %19 = vector.shape_cast %18 : vector<1x8x32xf32> to vector<8x32xf32>
    %20 = arith.index_cast %arg0 : i32 to index
    %21 = memref.load %arg1[%20] : memref<2xi32, #tpu.memory_space<smem>>
    %22 = tpu.iota {dimensions = array<i32: 1>} : vector<8x8xi32>
    %23 = vector.broadcast %21 : i32 to vector<8x8xi32>
    %24 = arith.cmpi slt, %22, %23 : vector<8x8xi32>
    %c1_i32 = arith.constant 1 : i32
    %25 = arith.cmpi sgt, %21, %c1_i32 : i32
    %26 = vector.broadcast %25 : i1 to vector<8x8xi1>
    %27 = arith.andi %24, %26 : vector<8x8xi1>
    %c0_20 = arith.constant 0 : index
    %c0_21 = arith.constant 0 : index
    %c0_22 = arith.constant 0 : index
    %28 = vector.load %arg7[%c0_20, %c0_21, %c0_22] : memref<2x32x96xf32, #tpu.memory_space<vmem>>, vector<1x32x96xf32>
    %29 = vector.shape_cast %28 : vector<1x32x96xf32> to vector<32x96xf32>
    %c0_23 = arith.constant 0 : index
    %c0_24 = arith.constant 0 : index
    %c0_25 = arith.constant 0 : index
    %30 = vector.load %arg8[%c0_23, %c0_24, %c0_25] : memref<2x32x32xf32, #tpu.memory_space<vmem>>, vector<1x32x32xf32>
    %31 = vector.shape_cast %30 : vector<1x32x32xf32> to vector<32x32xf32>
    %cst_26 = arith.constant dense<0.000000e+00> : vector<8x96xf32>
    %32 = tpu.matmul %19, %29, %cst_26 {dimension_numbers = #tpu.dot_dimension_numbers<[1], [0], [0], [1], [0, 0, 1, 1], [], []>} : vector<8x32xf32>, vector<32x96xf32>, vector<8x96xf32> -> vector<8x96xf32>
    %cst_27 = arith.constant 0.000000e+00 : f32
    %33 = vector.broadcast %cst_27 : f32 to vector<8x32xf32>
    %34 = vector.extract_strided_slice %32 {offsets = [0, 0], sizes = [8, 8], strides = [1, 1]} : vector<8x96xf32> to vector<8x8xf32>
    %35 = vector.extract_strided_slice %32 {offsets = [0, 32], sizes = [8, 8], strides = [1, 1]} : vector<8x96xf32> to vector<8x8xf32>
    %36 = vector.extract_strided_slice %32 {offsets = [0, 64], sizes = [8, 8], strides = [1, 1]} : vector<8x96xf32> to vector<8x8xf32>
    %cst_28 = arith.constant dense<0.000000e+00> : vector<8x8xf32>
    %37 = tpu.matmul %34, %35, %cst_28 {dimension_numbers = #tpu.dot_dimension_numbers<[1], [1], [0], [0], [0, 0, 1, 0], [], []>} : vector<8x8xf32>, vector<8x8xf32>, vector<8x8xf32> -> vector<8x8xf32>
    %cst_29 = arith.constant 0.353553385 : f32
    %38 = vector.broadcast %cst_29 : f32 to vector<8x8xf32>
    %39 = arith.mulf %37, %38 : vector<8x8xf32>
    %cst_30 = arith.constant -1.000000e+09 : f32
    %40 = vector.broadcast %cst_30 : f32 to vector<8x8xf32>
    %41 = arith.select %27, %40, %39 : vector<8x8xi1>, vector<8x8xf32>
    %cst_31 = arith.constant dense<0xFF800000> : vector<8xf32>
    %42 = vector.multi_reduction <maximumf>, %41, %cst_31 [1] : vector<8x8xf32> to vector<8xf32>
    %43 = vector.shape_cast %42 : vector<8xf32> to vector<8x1xf32>
    %44 = vector.broadcast %43 : vector<8x1xf32> to vector<8x8xf32>
    %45 = arith.subf %41, %44 : vector<8x8xf32>
    %46 = math.exp %45 : vector<8x8xf32>
    %cst_32 = arith.constant dense<0.000000e+00> : vector<8xf32>
    %47 = vector.multi_reduction <add>, %46, %cst_32 [1] : vector<8x8xf32> to vector<8xf32>
    %48 = vector.shape_cast %47 : vector<8xf32> to vector<8x1xf32>
    %49 = tpu.reciprocal %48 {approx = true} : vector<8x1xf32> -> vector<8x1xf32>
    %50 = vector.broadcast %49 : vector<8x1xf32> to vector<8x8xf32>
    %51 = arith.mulf %46, %50 : vector<8x8xf32>
    %c0_33 = arith.constant 0 : index
    %c0_34 = arith.constant 0 : index
    %c0_35 = arith.constant 0 : index
    %c0_36 = arith.constant 0 : index
    %c0_37 = arith.constant 0 : index
    %52 = vector.load %arg16[%c0_33, %c0_34, %c0_35, %c0_36, %c0_37] : memref<1x2x4x8x8xf32, #tpu.memory_space<vmem>>, vector<1x1x1x8x8xf32>
    %53 = vector.shape_cast %52 : vector<1x1x1x8x8xf32> to vector<8x8xf32>
    %54 = vector.shape_cast %51 : vector<8x8xf32> to vector<1x1x1x8x8xf32>
    tpu.vector_store %arg16[%c0_33, %c0_34, %c0_35, %c0_36, %c0_37], %54 {strides = array<i32>} : memref<1x2x4x8x8xf32, #tpu.memory_space<vmem>>, vector<1x1x1x8x8xf32>,
    %cst_38 = arith.constant dense<0.000000e+00> : vector<8x8xf32>
    %55 = tpu.matmul %51, %36, %cst_38 {dimension_numbers = #tpu.dot_dimension_numbers<[1], [0], [0], [1], [0, 0, 1, 1], [], []>} : vector<8x8xf32>, vector<8x8xf32>, vector<8x8xf32> -> vector<8x8xf32>
    %56 = vector.extract_strided_slice %31 {offsets = [0, 0], sizes = [8, 32], strides = [1, 1]} : vector<32x32xf32> to vector<8x32xf32>
    %cst_39 = arith.constant dense<0.000000e+00> : vector<8x32xf32>
    %57 = tpu.matmul %55, %56, %cst_39 {dimension_numbers = #tpu.dot_dimension_numbers<[1], [0], [0], [1], [0, 0, 1, 1], [], []>} : vector<8x8xf32>, vector<8x32xf32>, vector<8x32xf32> -> vector<8x32xf32>
    %58 = arith.addf %33, %57 : vector<8x32xf32>
    %59 = vector.extract_strided_slice %32 {offsets = [0, 8], sizes = [8, 8], strides = [1, 1]} : vector<8x96xf32> to vector<8x8xf32>
    %60 = vector.extract_strided_slice %32 {offsets = [0, 40], sizes = [8, 8], strides = [1, 1]} : vector<8x96xf32> to vector<8x8xf32>
    %61 = vector.extract_strided_slice %32 {offsets = [0, 72], sizes = [8, 8], strides = [1, 1]} : vector<8x96xf32> to vector<8x8xf32>
    %cst_40 = arith.constant dense<0.000000e+00> : vector<8x8xf32>
    %62 = tpu.matmul %59, %60, %cst_40 {dimension_numbers = #tpu.dot_dimension_numbers<[1], [1], [0], [0], [0, 0, 1, 0], [], []>} : vector<8x8xf32>, vector<8x8xf32>, vector<8x8xf32> -> vector<8x8xf32>
    %cst_41 = arith.constant 0.353553385 : f32
    %63 = vector.broadcast %cst_41 : f32 to vector<8x8xf32>
    %64 = arith.mulf %62, %63 : vector<8x8xf32>
    %cst_42 = arith.constant -1.000000e+09 : f32
    %65 = vector.broadcast %cst_42 : f32 to vector<8x8xf32>
    %66 = arith.select %27, %65, %64 : vector<8x8xi1>, vector<8x8xf32>
    %cst_43 = arith.constant dense<0xFF800000> : vector<8xf32>
    %67 = vector.multi_reduction <maximumf>, %66, %cst_43 [1] : vector<8x8xf32> to vector<8xf32>
    %68 = vector.shape_cast %67 : vector<8xf32> to vector<8x1xf32>
    %69 = vector.broadcast %68 : vector<8x1xf32> to vector<8x8xf32>
    %70 = arith.subf %66, %69 : vector<8x8xf32>
    %71 = math.exp %70 : vector<8x8xf32>
    %cst_44 = arith.constant dense<0.000000e+00> : vector<8xf32>
    %72 = vector.multi_reduction <add>, %71, %cst_44 [1] : vector<8x8xf32> to vector<8xf32>
    %73 = vector.shape_cast %72 : vector<8xf32> to vector<8x1xf32>
    %74 = tpu.reciprocal %73 {approx = true} : vector<8x1xf32> -> vector<8x1xf32>
    %75 = vector.broadcast %74 : vector<8x1xf32> to vector<8x8xf32>
    %76 = arith.mulf %71, %75 : vector<8x8xf32>
    %c0_45 = arith.constant 0 : index
    %c0_46 = arith.constant 0 : index
    %c1 = arith.constant 1 : index
    %c0_47 = arith.constant 0 : index
    %c0_48 = arith.constant 0 : index
    %77 = vector.load %arg16[%c0_45, %c0_46, %c1, %c0_47, %c0_48] : memref<1x2x4x8x8xf32, #tpu.memory_space<vmem>>, vector<1x1x1x8x8xf32>
    %78 = vector.shape_cast %77 : vector<1x1x1x8x8xf32> to vector<8x8xf32>
    %79 = vector.shape_cast %76 : vector<8x8xf32> to vector<1x1x1x8x8xf32>
    tpu.vector_store %arg16[%c0_45, %c0_46, %c1, %c0_47, %c0_48], %79 {strides = array<i32>} : memref<1x2x4x8x8xf32, #tpu.memory_space<vmem>>, vector<1x1x1x8x8xf32>,
    %cst_49 = arith.constant dense<0.000000e+00> : vector<8x8xf32>
    %80 = tpu.matmul %76, %61, %cst_49 {dimension_numbers = #tpu.dot_dimension_numbers<[1], [0], [0], [1], [0, 0, 1, 1], [], []>} : vector<8x8xf32>, vector<8x8xf32>, vector<8x8xf32> -> vector<8x8xf32>
    %81 = vector.extract_strided_slice %31 {offsets = [8, 0], sizes = [8, 32], strides = [1, 1]} : vector<32x32xf32> to vector<8x32xf32>
    %cst_50 = arith.constant dense<0.000000e+00> : vector<8x32xf32>
    %82 = tpu.matmul %80, %81, %cst_50 {dimension_numbers = #tpu.dot_dimension_numbers<[1], [0], [0], [1], [0, 0, 1, 1], [], []>} : vector<8x8xf32>, vector<8x32xf32>, vector<8x32xf32> -> vector<8x32xf32>
    %83 = arith.addf %58, %82 : vector<8x32xf32>
    %84 = vector.extract_strided_slice %32 {offsets = [0, 16], sizes = [8, 8], strides = [1, 1]} : vector<8x96xf32> to vector<8x8xf32>
    %85 = vector.extract_strided_slice %32 {offsets = [0, 48], sizes = [8, 8], strides = [1, 1]} : vector<8x96xf32> to vector<8x8xf32>
    %86 = vector.extract_strided_slice %32 {offsets = [0, 80], sizes = [8, 8], strides = [1, 1]} : vector<8x96xf32> to vector<8x8xf32>
    %cst_51 = arith.constant dense<0.000000e+00> : vector<8x8xf32>
    %87 = tpu.matmul %84, %85, %cst_51 {dimension_numbers = #tpu.dot_dimension_numbers<[1], [1], [0], [0], [0, 0, 1, 0], [], []>} : vector<8x8xf32>, vector<8x8xf32>, vector<8x8xf32> -> vector<8x8xf32>
    %cst_52 = arith.constant 0.353553385 : f32
    %88 = vector.broadcast %cst_52 : f32 to vector<8x8xf32>
    %89 = arith.mulf %87, %88 : vector<8x8xf32>
    %cst_53 = arith.constant -1.000000e+09 : f32
    %90 = vector.broadcast %cst_53 : f32 to vector<8x8xf32>
    %91 = arith.select %27, %90, %89 : vector<8x8xi1>, vector<8x8xf32>
    %cst_54 = arith.constant dense<0xFF800000> : vector<8xf32>
    %92 = vector.multi_reduction <maximumf>, %91, %cst_54 [1] : vector<8x8xf32> to vector<8xf32>
    %93 = vector.shape_cast %92 : vector<8xf32> to vector<8x1xf32>
    %94 = vector.broadcast %93 : vector<8x1xf32> to vector<8x8xf32>
    %95 = arith.subf %91, %94 : vector<8x8xf32>
    %96 = math.exp %95 : vector<8x8xf32>
    %cst_55 = arith.constant dense<0.000000e+00> : vector<8xf32>
    %97 = vector.multi_reduction <add>, %96, %cst_55 [1] : vector<8x8xf32> to vector<8xf32>
    %98 = vector.shape_cast %97 : vector<8xf32> to vector<8x1xf32>
    %99 = tpu.reciprocal %98 {approx = true} : vector<8x1xf32> -> vector<8x1xf32>
    %100 = vector.broadcast %99 : vector<8x1xf32> to vector<8x8xf32>
    %101 = arith.mulf %96, %100 : vector<8x8xf32>
    %c0_56 = arith.constant 0 : index
    %c0_57 = arith.constant 0 : index
    %c2 = arith.constant 2 : index
    %c0_58 = arith.constant 0 : index
    %c0_59 = arith.constant 0 : index
    %102 = vector.load %arg16[%c0_56, %c0_57, %c2, %c0_58, %c0_59] : memref<1x2x4x8x8xf32, #tpu.memory_space<vmem>>, vector<1x1x1x8x8xf32>
    %103 = vector.shape_cast %102 : vector<1x1x1x8x8xf32> to vector<8x8xf32>
    %104 = vector.shape_cast %101 : vector<8x8xf32> to vector<1x1x1x8x8xf32>
    tpu.vector_store %arg16[%c0_56, %c0_57, %c2, %c0_58, %c0_59], %104 {strides = array<i32>} : memref<1x2x4x8x8xf32, #tpu.memory_space<vmem>>, vector<1x1x1x8x8xf32>,
    %cst_60 = arith.constant dense<0.000000e+00> : vector<8x8xf32>
    %105 = tpu.matmul %101, %86, %cst_60 {dimension_numbers = #tpu.dot_dimension_numbers<[1], [0], [0], [1], [0, 0, 1, 1], [], []>} : vector<8x8xf32>, vector<8x8xf32>, vector<8x8xf32> -> vector<8x8xf32>
    %106 = vector.extract_strided_slice %31 {offsets = [16, 0], sizes = [8, 32], strides = [1, 1]} : vector<32x32xf32> to vector<8x32xf32>
    %cst_61 = arith.constant dense<0.000000e+00> : vector<8x32xf32>
    %107 = tpu.matmul %105, %106, %cst_61 {dimension_numbers = #tpu.dot_dimension_numbers<[1], [0], [0], [1], [0, 0, 1, 1], [], []>} : vector<8x8xf32>, vector<8x32xf32>, vector<8x32xf32> -> vector<8x32xf32>
    %108 = arith.addf %83, %107 : vector<8x32xf32>
    %109 = vector.extract_strided_slice %32 {offsets = [0, 24], sizes = [8, 8], strides = [1, 1]} : vector<8x96xf32> to vector<8x8xf32>
    %110 = vector.extract_strided_slice %32 {offsets = [0, 56], sizes = [8, 8], strides = [1, 1]} : vector<8x96xf32> to vector<8x8xf32>
    %111 = vector.extract_strided_slice %32 {offsets = [0, 88], sizes = [8, 8], strides = [1, 1]} : vector<8x96xf32> to vector<8x8xf32>
    %cst_62 = arith.constant dense<0.000000e+00> : vector<8x8xf32>
    %112 = tpu.matmul %109, %110, %cst_62 {dimension_numbers = #tpu.dot_dimension_numbers<[1], [1], [0], [0], [0, 0, 1, 0], [], []>} : vector<8x8xf32>, vector<8x8xf32>, vector<8x8xf32> -> vector<8x8xf32>
    %cst_63 = arith.constant 0.353553385 : f32
    %113 = vector.broadcast %cst_63 : f32 to vector<8x8xf32>
    %114 = arith.mulf %112, %113 : vector<8x8xf32>
    %cst_64 = arith.constant -1.000000e+09 : f32
    %115 = vector.broadcast %cst_64 : f32 to vector<8x8xf32>
    %116 = arith.select %27, %115, %114 : vector<8x8xi1>, vector<8x8xf32>
    %cst_65 = arith.constant dense<0xFF800000> : vector<8xf32>
    %117 = vector.multi_reduction <maximumf>, %116, %cst_65 [1] : vector<8x8xf32> to vector<8xf32>
    %118 = vector.shape_cast %117 : vector<8xf32> to vector<8x1xf32>
    %119 = vector.broadcast %118 : vector<8x1xf32> to vector<8x8xf32>
    %120 = arith.subf %116, %119 : vector<8x8xf32>
    %121 = math.exp %120 : vector<8x8xf32>
    %cst_66 = arith.constant dense<0.000000e+00> : vector<8xf32>
    %122 = vector.multi_reduction <add>, %121, %cst_66 [1] : vector<8x8xf32> to vector<8xf32>
    %123 = vector.shape_cast %122 : vector<8xf32> to vector<8x1xf32>
    %124 = tpu.reciprocal %123 {approx = true} : vector<8x1xf32> -> vector<8x1xf32>
    %125 = vector.broadcast %124 : vector<8x1xf32> to vector<8x8xf32>
    %126 = arith.mulf %121, %125 : vector<8x8xf32>
    %c0_67 = arith.constant 0 : index
    %c0_68 = arith.constant 0 : index
    %c3 = arith.constant 3 : index
    %c0_69 = arith.constant 0 : index
    %c0_70 = arith.constant 0 : index
    %127 = vector.load %arg16[%c0_67, %c0_68, %c3, %c0_69, %c0_70] : memref<1x2x4x8x8xf32, #tpu.memory_space<vmem>>, vector<1x1x1x8x8xf32>
    %128 = vector.shape_cast %127 : vector<1x1x1x8x8xf32> to vector<8x8xf32>
    %129 = vector.shape_cast %126 : vector<8x8xf32> to vector<1x1x1x8x8xf32>
    tpu.vector_store %arg16[%c0_67, %c0_68, %c3, %c0_69, %c0_70], %129 {strides = array<i32>} : memref<1x2x4x8x8xf32, #tpu.memory_space<vmem>>, vector<1x1x1x8x8xf32>,
    %cst_71 = arith.constant dense<0.000000e+00> : vector<8x8xf32>
    %130 = tpu.matmul %126, %111, %cst_71 {dimension_numbers = #tpu.dot_dimension_numbers<[1], [0], [0], [1], [0, 0, 1, 1], [], []>} : vector<8x8xf32>, vector<8x8xf32>, vector<8x8xf32> -> vector<8x8xf32>
    %131 = vector.extract_strided_slice %31 {offsets = [24, 0], sizes = [8, 32], strides = [1, 1]} : vector<32x32xf32> to vector<8x32xf32>
    %cst_72 = arith.constant dense<0.000000e+00> : vector<8x32xf32>
    %132 = tpu.matmul %130, %131, %cst_72 {dimension_numbers = #tpu.dot_dimension_numbers<[1], [0], [0], [1], [0, 0, 1, 1], [], []>} : vector<8x8xf32>, vector<8x32xf32>, vector<8x32xf32> -> vector<8x32xf32>
    %133 = arith.addf %108, %132 : vector<8x32xf32>
    %134 = arith.addf %133, %19 : vector<8x32xf32>
    %c0_73 = arith.constant 0 : index
    %c0_74 = arith.constant 0 : index
    %c0_75 = arith.constant 0 : index
    %135 = vector.load %arg9[%c0_73, %c0_74, %c0_75] : memref<2x1x32xf32, #tpu.memory_space<vmem>>, vector<1x1x32xf32>
    %136 = vector.shape_cast %135 : vector<1x1x32xf32> to vector<1x32xf32>
    %c0_76 = arith.constant 0 : index
    %c0_77 = arith.constant 0 : index
    %c0_78 = arith.constant 0 : index
    %137 = vector.load %arg10[%c0_76, %c0_77, %c0_78] : memref<2x1x32xf32, #tpu.memory_space<vmem>>, vector<1x1x32xf32>
    %138 = vector.shape_cast %137 : vector<1x1x32xf32> to vector<1x32xf32>
    %cst_79 = arith.constant dense<0.000000e+00> : vector<8xf32>
    %139 = vector.multi_reduction <add>, %134, %cst_79 [1] : vector<8x32xf32> to vector<8xf32>
    %140 = vector.shape_cast %139 : vector<8xf32> to vector<8x1xf32>
    %cst_80 = arith.constant 3.200000e+01 : f32
    %141 = vector.broadcast %cst_80 : f32 to vector<8x1xf32>
    %142 = arith.divf %140, %141 : vector<8x1xf32>
    %143 = vector.broadcast %142 : vector<8x1xf32> to vector<8x32xf32>
    %144 = arith.subf %134, %143 : vector<8x32xf32>
    %145 = vector.broadcast %142 : vector<8x1xf32> to vector<8x32xf32>
    %146 = arith.subf %134, %145 : vector<8x32xf32>
    %147 = arith.mulf %144, %146 : vector<8x32xf32>
    %cst_81 = arith.constant dense<0.000000e+00> : vector<8xf32>
    %148 = vector.multi_reduction <add>, %147, %cst_81 [1] : vector<8x32xf32> to vector<8xf32>
    %149 = vector.shape_cast %148 : vector<8xf32> to vector<8x1xf32>
    %cst_82 = arith.constant 3.200000e+01 : f32
    %150 = vector.broadcast %cst_82 : f32 to vector<8x1xf32>
    %151 = arith.divf %149, %150 : vector<8x1xf32>
    %152 = vector.broadcast %142 : vector<8x1xf32> to vector<8x32xf32>
    %153 = arith.subf %134, %152 : vector<8x32xf32>
    %cst_83 = arith.constant 9.99999974E-6 : f32
    %154 = vector.broadcast %cst_83 : f32 to vector<8x1xf32>
    %155 = arith.addf %151, %154 : vector<8x1xf32>
    %156 = math.rsqrt %155 : vector<8x1xf32>
    %157 = vector.broadcast %156 : vector<8x1xf32> to vector<8x32xf32>
    %158 = arith.mulf %153, %157 : vector<8x32xf32>
    %159 = vector.broadcast %136 : vector<1x32xf32> to vector<8x32xf32>
    %160 = arith.mulf %158, %159 : vector<8x32xf32>
    %161 = vector.broadcast %138 : vector<1x32xf32> to vector<8x32xf32>
    %162 = arith.addf %160, %161 : vector<8x32xf32>
    %c0_84 = arith.constant 0 : index
    %c0_85 = arith.constant 0 : index
    %c0_86 = arith.constant 0 : index
    %163 = vector.load %arg11[%c0_84, %c0_85, %c0_86] : memref<2x32x64xf32, #tpu.memory_space<vmem>>, vector<1x32x64xf32>
    %164 = vector.shape_cast %163 : vector<1x32x64xf32> to vector<32x64xf32>
    %cst_87 = arith.constant dense<0.000000e+00> : vector<8x64xf32>
    %165 = tpu.matmul %162, %164, %cst_87 {dimension_numbers = #tpu.dot_dimension_numbers<[1], [0], [0], [1], [0, 0, 1, 1], [], []>} : vector<8x32xf32>, vector<32x64xf32>, vector<8x64xf32> -> vector<8x64xf32>
    %cst_88 = arith.constant 0.000000e+00 : f32
    %166 = vector.broadcast %cst_88 : f32 to vector<8x64xf32>
    %167 = arith.maximumf %165, %166 : vector<8x64xf32>
    %c0_89 = arith.constant 0 : index
    %c0_90 = arith.constant 0 : index
    %c0_91 = arith.constant 0 : index
    %168 = vector.load %arg12[%c0_89, %c0_90, %c0_91] : memref<2x64x32xf32, #tpu.memory_space<vmem>>, vector<1x64x32xf32>
    %169 = vector.shape_cast %168 : vector<1x64x32xf32> to vector<64x32xf32>
    %cst_92 = arith.constant dense<0.000000e+00> : vector<8x32xf32>
    %170 = tpu.matmul %167, %169, %cst_92 {dimension_numbers = #tpu.dot_dimension_numbers<[1], [0], [0], [1], [0, 0, 1, 1], [], []>} : vector<8x64xf32>, vector<64x32xf32>, vector<8x32xf32> -> vector<8x32xf32>
    %171 = arith.addf %170, %162 : vector<8x32xf32>
    %c0_93 = arith.constant 0 : index
    %c0_94 = arith.constant 0 : index
    %c0_95 = arith.constant 0 : index
    %172 = vector.load %arg13[%c0_93, %c0_94, %c0_95] : memref<2x1x32xf32, #tpu.memory_space<vmem>>, vector<1x1x32xf32>
    %173 = vector.shape_cast %172 : vector<1x1x32xf32> to vector<1x32xf32>
    %c0_96 = arith.constant 0 : index
    %c0_97 = arith.constant 0 : index
    %c0_98 = arith.constant 0 : index
    %174 = vector.load %arg14[%c0_96, %c0_97, %c0_98] : memref<2x1x32xf32, #tpu.memory_space<vmem>>, vector<1x1x32xf32>
    %175 = vector.shape_cast %174 : vector<1x1x32xf32> to vector<1x32xf32>
    %cst_99 = arith.constant dense<0.000000e+00> : vector<8xf32>
    %176 = vector.multi_reduction <add>, %171, %cst_99 [1] : vector<8x32xf32> to vector<8xf32>
    %177 = vector.shape_cast %176 : vector<8xf32> to vector<8x1xf32>
    %cst_100 = arith.constant 3.200000e+01 : f32
    %178 = vector.broadcast %cst_100 : f32 to vector<8x1xf32>
    %179 = arith.divf %177, %178 : vector<8x1xf32>
    %180 = vector.broadcast %179 : vector<8x1xf32> to vector<8x32xf32>
    %181 = arith.subf %171, %180 : vector<8x32xf32>
    %182 = vector.broadcast %179 : vector<8x1xf32> to vector<8x32xf32>
    %183 = arith.subf %171, %182 : vector<8x32xf32>
    %184 = arith.mulf %181, %183 : vector<8x32xf32>
    %cst_101 = arith.constant dense<0.000000e+00> : vector<8xf32>
    %185 = vector.multi_reduction <add>, %184, %cst_101 [1] : vector<8x32xf32> to vector<8xf32>
    %186 = vector.shape_cast %185 : vector<8xf32> to vector<8x1xf32>
    %cst_102 = arith.constant 3.200000e+01 : f32
    %187 = vector.broadcast %cst_102 : f32 to vector<8x1xf32>
    %188 = arith.divf %186, %187 : vector<8x1xf32>
    %189 = vector.broadcast %179 : vector<8x1xf32> to vector<8x32xf32>
    %190 = arith.subf %171, %189 : vector<8x32xf32>
    %cst_103 = arith.constant 9.99999974E-6 : f32
    %191 = vector.broadcast %cst_103 : f32 to vector<8x1xf32>
    %192 = arith.addf %188, %191 : vector<8x1xf32>
    %193 = math.rsqrt %192 : vector<8x1xf32>
    %194 = vector.broadcast %193 : vector<8x1xf32> to vector<8x32xf32>
    %195 = arith.mulf %190, %194 : vector<8x32xf32>
    %196 = vector.broadcast %173 : vector<1x32xf32> to vector<8x32xf32>
    %197 = arith.mulf %195, %196 : vector<8x32xf32>
    %198 = vector.broadcast %175 : vector<1x32xf32> to vector<8x32xf32>
    %199 = arith.addf %197, %198 : vector<8x32xf32>
    %c1_104 = arith.constant 1 : index
    %c0_105 = arith.constant 0 : index
    %c0_106 = arith.constant 0 : index
    %200 = vector.load %arg7[%c1_104, %c0_105, %c0_106] : memref<2x32x96xf32, #tpu.memory_space<vmem>>, vector<1x32x96xf32>
    %201 = vector.shape_cast %200 : vector<1x32x96xf32> to vector<32x96xf32>
    %c1_107 = arith.constant 1 : index
    %c0_108 = arith.constant 0 : index
    %c0_109 = arith.constant 0 : index
    %202 = vector.load %arg8[%c1_107, %c0_108, %c0_109] : memref<2x32x32xf32, #tpu.memory_space<vmem>>, vector<1x32x32xf32>
    %203 = vector.shape_cast %202 : vector<1x32x32xf32> to vector<32x32xf32>
    %cst_110 = arith.constant dense<0.000000e+00> : vector<8x96xf32>
    %204 = tpu.matmul %199, %201, %cst_110 {dimension_numbers = #tpu.dot_dimension_numbers<[1], [0], [0], [1], [0, 0, 1, 1], [], []>} : vector<8x32xf32>, vector<32x96xf32>, vector<8x96xf32> -> vector<8x96xf32>
    %cst_111 = arith.constant 0.000000e+00 : f32
    %205 = vector.broadcast %cst_111 : f32 to vector<8x32xf32>
    %206 = vector.extract_strided_slice %204 {offsets = [0, 0], sizes = [8, 8], strides = [1, 1]} : vector<8x96xf32> to vector<8x8xf32>
    %207 = vector.extract_strided_slice %204 {offsets = [0, 32], sizes = [8, 8], strides = [1, 1]} : vector<8x96xf32> to vector<8x8xf32>
    %208 = vector.extract_strided_slice %204 {offsets = [0, 64], sizes = [8, 8], strides = [1, 1]} : vector<8x96xf32> to vector<8x8xf32>
    %cst_112 = arith.constant dense<0.000000e+00> : vector<8x8xf32>
    %209 = tpu.matmul %206, %207, %cst_112 {dimension_numbers = #tpu.dot_dimension_numbers<[1], [1], [0], [0], [0, 0, 1, 0], [], []>} : vector<8x8xf32>, vector<8x8xf32>, vector<8x8xf32> -> vector<8x8xf32>
    %cst_113 = arith.constant 0.353553385 : f32
    %210 = vector.broadcast %cst_113 : f32 to vector<8x8xf32>
    %211 = arith.mulf %209, %210 : vector<8x8xf32>
    %cst_114 = arith.constant -1.000000e+09 : f32
    %212 = vector.broadcast %cst_114 : f32 to vector<8x8xf32>
    %213 = arith.select %27, %212, %211 : vector<8x8xi1>, vector<8x8xf32>
    %cst_115 = arith.constant dense<0xFF800000> : vector<8xf32>
    %214 = vector.multi_reduction <maximumf>, %213, %cst_115 [1] : vector<8x8xf32> to vector<8xf32>
    %215 = vector.shape_cast %214 : vector<8xf32> to vector<8x1xf32>
    %216 = vector.broadcast %215 : vector<8x1xf32> to vector<8x8xf32>
    %217 = arith.subf %213, %216 : vector<8x8xf32>
    %218 = math.exp %217 : vector<8x8xf32>
    %cst_116 = arith.constant dense<0.000000e+00> : vector<8xf32>
    %219 = vector.multi_reduction <add>, %218, %cst_116 [1] : vector<8x8xf32> to vector<8xf32>
    %220 = vector.shape_cast %219 : vector<8xf32> to vector<8x1xf32>
    %221 = tpu.reciprocal %220 {approx = true} : vector<8x1xf32> -> vector<8x1xf32>
    %222 = vector.broadcast %221 : vector<8x1xf32> to vector<8x8xf32>
    %223 = arith.mulf %218, %222 : vector<8x8xf32>
    %c0_117 = arith.constant 0 : index
    %c1_118 = arith.constant 1 : index
    %c0_119 = arith.constant 0 : index
    %c0_120 = arith.constant 0 : index
    %c0_121 = arith.constant 0 : index
    %224 = vector.load %arg16[%c0_117, %c1_118, %c0_119, %c0_120, %c0_121] : memref<1x2x4x8x8xf32, #tpu.memory_space<vmem>>, vector<1x1x1x8x8xf32>
    %225 = vector.shape_cast %224 : vector<1x1x1x8x8xf32> to vector<8x8xf32>
    %226 = vector.shape_cast %223 : vector<8x8xf32> to vector<1x1x1x8x8xf32>
    tpu.vector_store %arg16[%c0_117, %c1_118, %c0_119, %c0_120, %c0_121], %226 {strides = array<i32>} : memref<1x2x4x8x8xf32, #tpu.memory_space<vmem>>, vector<1x1x1x8x8xf32>,
    %cst_122 = arith.constant dense<0.000000e+00> : vector<8x8xf32>
    %227 = tpu.matmul %223, %208, %cst_122 {dimension_numbers = #tpu.dot_dimension_numbers<[1], [0], [0], [1], [0, 0, 1, 1], [], []>} : vector<8x8xf32>, vector<8x8xf32>, vector<8x8xf32> -> vector<8x8xf32>
    %228 = vector.extract_strided_slice %203 {offsets = [0, 0], sizes = [8, 32], strides = [1, 1]} : vector<32x32xf32> to vector<8x32xf32>
    %cst_123 = arith.constant dense<0.000000e+00> : vector<8x32xf32>
    %229 = tpu.matmul %227, %228, %cst_123 {dimension_numbers = #tpu.dot_dimension_numbers<[1], [0], [0], [1], [0, 0, 1, 1], [], []>} : vector<8x8xf32>, vector<8x32xf32>, vector<8x32xf32> -> vector<8x32xf32>
    %230 = arith.addf %205, %229 : vector<8x32xf32>
    %231 = vector.extract_strided_slice %204 {offsets = [0, 8], sizes = [8, 8], strides = [1, 1]} : vector<8x96xf32> to vector<8x8xf32>
    %232 = vector.extract_strided_slice %204 {offsets = [0, 40], sizes = [8, 8], strides = [1, 1]} : vector<8x96xf32> to vector<8x8xf32>
    %233 = vector.extract_strided_slice %204 {offsets = [0, 72], sizes = [8, 8], strides = [1, 1]} : vector<8x96xf32> to vector<8x8xf32>
    %cst_124 = arith.constant dense<0.000000e+00> : vector<8x8xf32>
    %234 = tpu.matmul %231, %232, %cst_124 {dimension_numbers = #tpu.dot_dimension_numbers<[1], [1], [0], [0], [0, 0, 1, 0], [], []>} : vector<8x8xf32>, vector<8x8xf32>, vector<8x8xf32> -> vector<8x8xf32>
    %cst_125 = arith.constant 0.353553385 : f32
    %235 = vector.broadcast %cst_125 : f32 to vector<8x8xf32>
    %236 = arith.mulf %234, %235 : vector<8x8xf32>
    %cst_126 = arith.constant -1.000000e+09 : f32
    %237 = vector.broadcast %cst_126 : f32 to vector<8x8xf32>
    %238 = arith.select %27, %237, %236 : vector<8x8xi1>, vector<8x8xf32>
    %cst_127 = arith.constant dense<0xFF800000> : vector<8xf32>
    %239 = vector.multi_reduction <maximumf>, %238, %cst_127 [1] : vector<8x8xf32> to vector<8xf32>
    %240 = vector.shape_cast %239 : vector<8xf32> to vector<8x1xf32>
    %241 = vector.broadcast %240 : vector<8x1xf32> to vector<8x8xf32>
    %242 = arith.subf %238, %241 : vector<8x8xf32>
    %243 = math.exp %242 : vector<8x8xf32>
    %cst_128 = arith.constant dense<0.000000e+00> : vector<8xf32>
    %244 = vector.multi_reduction <add>, %243, %cst_128 [1] : vector<8x8xf32> to vector<8xf32>
    %245 = vector.shape_cast %244 : vector<8xf32> to vector<8x1xf32>
    %246 = tpu.reciprocal %245 {approx = true} : vector<8x1xf32> -> vector<8x1xf32>
    %247 = vector.broadcast %246 : vector<8x1xf32> to vector<8x8xf32>
    %248 = arith.mulf %243, %247 : vector<8x8xf32>
    %c0_129 = arith.constant 0 : index
    %c1_130 = arith.constant 1 : index
    %c1_131 = arith.constant 1 : index
    %c0_132 = arith.constant 0 : index
    %c0_133 = arith.constant 0 : index
    %249 = vector.load %arg16[%c0_129, %c1_130, %c1_131, %c0_132, %c0_133] : memref<1x2x4x8x8xf32, #tpu.memory_space<vmem>>, vector<1x1x1x8x8xf32>
    %250 = vector.shape_cast %249 : vector<1x1x1x8x8xf32> to vector<8x8xf32>
    %251 = vector.shape_cast %248 : vector<8x8xf32> to vector<1x1x1x8x8xf32>
    tpu.vector_store %arg16[%c0_129, %c1_130, %c1_131, %c0_132, %c0_133], %251 {strides = array<i32>} : memref<1x2x4x8x8xf32, #tpu.memory_space<vmem>>, vector<1x1x1x8x8xf32>,
    %cst_134 = arith.constant dense<0.000000e+00> : vector<8x8xf32>
    %252 = tpu.matmul %248, %233, %cst_134 {dimension_numbers = #tpu.dot_dimension_numbers<[1], [0], [0], [1], [0, 0, 1, 1], [], []>} : vector<8x8xf32>, vector<8x8xf32>, vector<8x8xf32> -> vector<8x8xf32>
    %253 = vector.extract_strided_slice %203 {offsets = [8, 0], sizes = [8, 32], strides = [1, 1]} : vector<32x32xf32> to vector<8x32xf32>
    %cst_135 = arith.constant dense<0.000000e+00> : vector<8x32xf32>
    %254 = tpu.matmul %252, %253, %cst_135 {dimension_numbers = #tpu.dot_dimension_numbers<[1], [0], [0], [1], [0, 0, 1, 1], [], []>} : vector<8x8xf32>, vector<8x32xf32>, vector<8x32xf32> -> vector<8x32xf32>
    %255 = arith.addf %230, %254 : vector<8x32xf32>
    %256 = vector.extract_strided_slice %204 {offsets = [0, 16], sizes = [8, 8], strides = [1, 1]} : vector<8x96xf32> to vector<8x8xf32>
    %257 = vector.extract_strided_slice %204 {offsets = [0, 48], sizes = [8, 8], strides = [1, 1]} : vector<8x96xf32> to vector<8x8xf32>
    %258 = vector.extract_strided_slice %204 {offsets = [0, 80], sizes = [8, 8], strides = [1, 1]} : vector<8x96xf32> to vector<8x8xf32>
    %cst_136 = arith.constant dense<0.000000e+00> : vector<8x8xf32>
    %259 = tpu.matmul %256, %257, %cst_136 {dimension_numbers = #tpu.dot_dimension_numbers<[1], [1], [0], [0], [0, 0, 1, 0], [], []>} : vector<8x8xf32>, vector<8x8xf32>, vector<8x8xf32> -> vector<8x8xf32>
    %cst_137 = arith.constant 0.353553385 : f32
    %260 = vector.broadcast %cst_137 : f32 to vector<8x8xf32>
    %261 = arith.mulf %259, %260 : vector<8x8xf32>
    %cst_138 = arith.constant -1.000000e+09 : f32
    %262 = vector.broadcast %cst_138 : f32 to vector<8x8xf32>
    %263 = arith.select %27, %262, %261 : vector<8x8xi1>, vector<8x8xf32>
    %cst_139 = arith.constant dense<0xFF800000> : vector<8xf32>
    %264 = vector.multi_reduction <maximumf>, %263, %cst_139 [1] : vector<8x8xf32> to vector<8xf32>
    %265 = vector.shape_cast %264 : vector<8xf32> to vector<8x1xf32>
    %266 = vector.broadcast %265 : vector<8x1xf32> to vector<8x8xf32>
    %267 = arith.subf %263, %266 : vector<8x8xf32>
    %268 = math.exp %267 : vector<8x8xf32>
    %cst_140 = arith.constant dense<0.000000e+00> : vector<8xf32>
    %269 = vector.multi_reduction <add>, %268, %cst_140 [1] : vector<8x8xf32> to vector<8xf32>
    %270 = vector.shape_cast %269 : vector<8xf32> to vector<8x1xf32>
    %271 = tpu.reciprocal %270 {approx = true} : vector<8x1xf32> -> vector<8x1xf32>
    %272 = vector.broadcast %271 : vector<8x1xf32> to vector<8x8xf32>
    %273 = arith.mulf %268, %272 : vector<8x8xf32>
    %c0_141 = arith.constant 0 : index
    %c1_142 = arith.constant 1 : index
    %c2_143 = arith.constant 2 : index
    %c0_144 = arith.constant 0 : index
    %c0_145 = arith.constant 0 : index
    %274 = vector.load %arg16[%c0_141, %c1_142, %c2_143, %c0_144, %c0_145] : memref<1x2x4x8x8xf32, #tpu.memory_space<vmem>>, vector<1x1x1x8x8xf32>
    %275 = vector.shape_cast %274 : vector<1x1x1x8x8xf32> to vector<8x8xf32>
    %276 = vector.shape_cast %273 : vector<8x8xf32> to vector<1x1x1x8x8xf32>
    tpu.vector_store %arg16[%c0_141, %c1_142, %c2_143, %c0_144, %c0_145], %276 {strides = array<i32>} : memref<1x2x4x8x8xf32, #tpu.memory_space<vmem>>, vector<1x1x1x8x8xf32>,
    %cst_146 = arith.constant dense<0.000000e+00> : vector<8x8xf32>
    %277 = tpu.matmul %273, %258, %cst_146 {dimension_numbers = #tpu.dot_dimension_numbers<[1], [0], [0], [1], [0, 0, 1, 1], [], []>} : vector<8x8xf32>, vector<8x8xf32>, vector<8x8xf32> -> vector<8x8xf32>
    %278 = vector.extract_strided_slice %203 {offsets = [16, 0], sizes = [8, 32], strides = [1, 1]} : vector<32x32xf32> to vector<8x32xf32>
    %cst_147 = arith.constant dense<0.000000e+00> : vector<8x32xf32>
    %279 = tpu.matmul %277, %278, %cst_147 {dimension_numbers = #tpu.dot_dimension_numbers<[1], [0], [0], [1], [0, 0, 1, 1], [], []>} : vector<8x8xf32>, vector<8x32xf32>, vector<8x32xf32> -> vector<8x32xf32>
    %280 = arith.addf %255, %279 : vector<8x32xf32>
    %281 = vector.extract_strided_slice %204 {offsets = [0, 24], sizes = [8, 8], strides = [1, 1]} : vector<8x96xf32> to vector<8x8xf32>
    %282 = vector.extract_strided_slice %204 {offsets = [0, 56], sizes = [8, 8], strides = [1, 1]} : vector<8x96xf32> to vector<8x8xf32>
    %283 = vector.extract_strided_slice %204 {offsets = [0, 88], sizes = [8, 8], strides = [1, 1]} : vector<8x96xf32> to vector<8x8xf32>
    %cst_148 = arith.constant dense<0.000000e+00> : vector<8x8xf32>
    %284 = tpu.matmul %281, %282, %cst_148 {dimension_numbers = #tpu.dot_dimension_numbers<[1], [1], [0], [0], [0, 0, 1, 0], [], []>} : vector<8x8xf32>, vector<8x8xf32>, vector<8x8xf32> -> vector<8x8xf32>
    %cst_149 = arith.constant 0.353553385 : f32
    %285 = vector.broadcast %cst_149 : f32 to vector<8x8xf32>
    %286 = arith.mulf %284, %285 : vector<8x8xf32>
    %cst_150 = arith.constant -1.000000e+09 : f32
    %287 = vector.broadcast %cst_150 : f32 to vector<8x8xf32>
    %288 = arith.select %27, %287, %286 : vector<8x8xi1>, vector<8x8xf32>
    %cst_151 = arith.constant dense<0xFF800000> : vector<8xf32>
    %289 = vector.multi_reduction <maximumf>, %288, %cst_151 [1] : vector<8x8xf32> to vector<8xf32>
    %290 = vector.shape_cast %289 : vector<8xf32> to vector<8x1xf32>
    %291 = vector.broadcast %290 : vector<8x1xf32> to vector<8x8xf32>
    %292 = arith.subf %288, %291 : vector<8x8xf32>
    %293 = math.exp %292 : vector<8x8xf32>
    %cst_152 = arith.constant dense<0.000000e+00> : vector<8xf32>
    %294 = vector.multi_reduction <add>, %293, %cst_152 [1] : vector<8x8xf32> to vector<8xf32>
    %295 = vector.shape_cast %294 : vector<8xf32> to vector<8x1xf32>
    %296 = tpu.reciprocal %295 {approx = true} : vector<8x1xf32> -> vector<8x1xf32>
    %297 = vector.broadcast %296 : vector<8x1xf32> to vector<8x8xf32>
    %298 = arith.mulf %293, %297 : vector<8x8xf32>
    %c0_153 = arith.constant 0 : index
    %c1_154 = arith.constant 1 : index
    %c3_155 = arith.constant 3 : index
    %c0_156 = arith.constant 0 : index
    %c0_157 = arith.constant 0 : index
    %299 = vector.load %arg16[%c0_153, %c1_154, %c3_155, %c0_156, %c0_157] : memref<1x2x4x8x8xf32, #tpu.memory_space<vmem>>, vector<1x1x1x8x8xf32>
    %300 = vector.shape_cast %299 : vector<1x1x1x8x8xf32> to vector<8x8xf32>
    %301 = vector.shape_cast %298 : vector<8x8xf32> to vector<1x1x1x8x8xf32>
    tpu.vector_store %arg16[%c0_153, %c1_154, %c3_155, %c0_156, %c0_157], %301 {strides = array<i32>} : memref<1x2x4x8x8xf32, #tpu.memory_space<vmem>>, vector<1x1x1x8x8xf32>,
    %cst_158 = arith.constant dense<0.000000e+00> : vector<8x8xf32>
    %302 = tpu.matmul %298, %283, %cst_158 {dimension_numbers = #tpu.dot_dimension_numbers<[1], [0], [0], [1], [0, 0, 1, 1], [], []>} : vector<8x8xf32>, vector<8x8xf32>, vector<8x8xf32> -> vector<8x8xf32>
    %303 = vector.extract_strided_slice %203 {offsets = [24, 0], sizes = [8, 32], strides = [1, 1]} : vector<32x32xf32> to vector<8x32xf32>
    %cst_159 = arith.constant dense<0.000000e+00> : vector<8x32xf32>
    %304 = tpu.matmul %302, %303, %cst_159 {dimension_numbers = #tpu.dot_dimension_numbers<[1], [0], [0], [1], [0, 0, 1, 1], [], []>} : vector<8x8xf32>, vector<8x32xf32>, vector<8x32xf32> -> vector<8x32xf32>
    %305 = arith.addf %280, %304 : vector<8x32xf32>
    %306 = arith.addf %305, %199 : vector<8x32xf32>
    %c1_160 = arith.constant 1 : index
    %c0_161 = arith.constant 0 : index
    %c0_162 = arith.constant 0 : index
    %307 = vector.load %arg9[%c1_160, %c0_161, %c0_162] : memref<2x1x32xf32, #tpu.memory_space<vmem>>, vector<1x1x32xf32>
    %308 = vector.shape_cast %307 : vector<1x1x32xf32> to vector<1x32xf32>
    %c1_163 = arith.constant 1 : index
    %c0_164 = arith.constant 0 : index
    %c0_165 = arith.constant 0 : index
    %309 = vector.load %arg10[%c1_163, %c0_164, %c0_165] : memref<2x1x32xf32, #tpu.memory_space<vmem>>, vector<1x1x32xf32>
    %310 = vector.shape_cast %309 : vector<1x1x32xf32> to vector<1x32xf32>
    %cst_166 = arith.constant dense<0.000000e+00> : vector<8xf32>
    %311 = vector.multi_reduction <add>, %306, %cst_166 [1] : vector<8x32xf32> to vector<8xf32>
    %312 = vector.shape_cast %311 : vector<8xf32> to vector<8x1xf32>
    %cst_167 = arith.constant 3.200000e+01 : f32
    %313 = vector.broadcast %cst_167 : f32 to vector<8x1xf32>
    %314 = arith.divf %312, %313 : vector<8x1xf32>
    %315 = vector.broadcast %314 : vector<8x1xf32> to vector<8x32xf32>
    %316 = arith.subf %306, %315 : vector<8x32xf32>
    %317 = vector.broadcast %314 : vector<8x1xf32> to vector<8x32xf32>
    %318 = arith.subf %306, %317 : vector<8x32xf32>
    %319 = arith.mulf %316, %318 : vector<8x32xf32>
    %cst_168 = arith.constant dense<0.000000e+00> : vector<8xf32>
    %320 = vector.multi_reduction <add>, %319, %cst_168 [1] : vector<8x32xf32> to vector<8xf32>
    %321 = vector.shape_cast %320 : vector<8xf32> to vector<8x1xf32>
    %cst_169 = arith.constant 3.200000e+01 : f32
    %322 = vector.broadcast %cst_169 : f32 to vector<8x1xf32>
    %323 = arith.divf %321, %322 : vector<8x1xf32>
    %324 = vector.broadcast %314 : vector<8x1xf32> to vector<8x32xf32>
    %325 = arith.subf %306, %324 : vector<8x32xf32>
    %cst_170 = arith.constant 9.99999974E-6 : f32
    %326 = vector.broadcast %cst_170 : f32 to vector<8x1xf32>
    %327 = arith.addf %323, %326 : vector<8x1xf32>
    %328 = math.rsqrt %327 : vector<8x1xf32>
    %329 = vector.broadcast %328 : vector<8x1xf32> to vector<8x32xf32>
    %330 = arith.mulf %325, %329 : vector<8x32xf32>
    %331 = vector.broadcast %308 : vector<1x32xf32> to vector<8x32xf32>
    %332 = arith.mulf %330, %331 : vector<8x32xf32>
    %333 = vector.broadcast %310 : vector<1x32xf32> to vector<8x32xf32>
    %334 = arith.addf %332, %333 : vector<8x32xf32>
    %c1_171 = arith.constant 1 : index
    %c0_172 = arith.constant 0 : index
    %c0_173 = arith.constant 0 : index
    %335 = vector.load %arg11[%c1_171, %c0_172, %c0_173] : memref<2x32x64xf32, #tpu.memory_space<vmem>>, vector<1x32x64xf32>
    %336 = vector.shape_cast %335 : vector<1x32x64xf32> to vector<32x64xf32>
    %cst_174 = arith.constant dense<0.000000e+00> : vector<8x64xf32>
    %337 = tpu.matmul %334, %336, %cst_174 {dimension_numbers = #tpu.dot_dimension_numbers<[1], [0], [0], [1], [0, 0, 1, 1], [], []>} : vector<8x32xf32>, vector<32x64xf32>, vector<8x64xf32> -> vector<8x64xf32>
    %cst_175 = arith.constant 0.000000e+00 : f32
    %338 = vector.broadcast %cst_175 : f32 to vector<8x64xf32>
    %339 = arith.maximumf %337, %338 : vector<8x64xf32>
    %c1_176 = arith.constant 1 : index
    %c0_177 = arith.constant 0 : index
    %c0_178 = arith.constant 0 : index
    %340 = vector.load %arg12[%c1_176, %c0_177, %c0_178] : memref<2x64x32xf32, #tpu.memory_space<vmem>>, vector<1x64x32xf32>
    %341 = vector.shape_cast %340 : vector<1x64x32xf32> to vector<64x32xf32>
    %cst_179 = arith.constant dense<0.000000e+00> : vector<8x32xf32>
    %342 = tpu.matmul %339, %341, %cst_179 {dimension_numbers = #tpu.dot_dimension_numbers<[1], [0], [0], [1], [0, 0, 1, 1], [], []>} : vector<8x64xf32>, vector<64x32xf32>, vector<8x32xf32> -> vector<8x32xf32>
    %343 = arith.addf %342, %334 : vector<8x32xf32>
    %c1_180 = arith.constant 1 : index
    %c0_181 = arith.constant 0 : index
    %c0_182 = arith.constant 0 : index
    %344 = vector.load %arg13[%c1_180, %c0_181, %c0_182] : memref<2x1x32xf32, #tpu.memory_space<vmem>>, vector<1x1x32xf32>
    %345 = vector.shape_cast %344 : vector<1x1x32xf32> to vector<1x32xf32>
    %c1_183 = arith.constant 1 : index
    %c0_184 = arith.constant 0 : index
    %c0_185 = arith.constant 0 : index
    %346 = vector.load %arg14[%c1_183, %c0_184, %c0_185] : memref<2x1x32xf32, #tpu.memory_space<vmem>>, vector<1x1x32xf32>
    %347 = vector.shape_cast %346 : vector<1x1x32xf32> to vector<1x32xf32>
    %cst_186 = arith.constant dense<0.000000e+00> : vector<8xf32>
    %348 = vector.multi_reduction <add>, %343, %cst_186 [1] : vector<8x32xf32> to vector<8xf32>
    %349 = vector.shape_cast %348 : vector<8xf32> to vector<8x1xf32>
    %cst_187 = arith.constant 3.200000e+01 : f32
    %350 = vector.broadcast %cst_187 : f32 to vector<8x1xf32>
    %351 = arith.divf %349, %350 : vector<8x1xf32>
    %352 = vector.broadcast %351 : vector<8x1xf32> to vector<8x32xf32>
    %353 = arith.subf %343, %352 : vector<8x32xf32>
    %354 = vector.broadcast %351 : vector<8x1xf32> to vector<8x32xf32>
    %355 = arith.subf %343, %354 : vector<8x32xf32>
    %356 = arith.mulf %353, %355 : vector<8x32xf32>
    %cst_188 = arith.constant dense<0.000000e+00> : vector<8xf32>
    %357 = vector.multi_reduction <add>, %356, %cst_188 [1] : vector<8x32xf32> to vector<8xf32>
    %358 = vector.shape_cast %357 : vector<8xf32> to vector<8x1xf32>
    %cst_189 = arith.constant 3.200000e+01 : f32
    %359 = vector.broadcast %cst_189 : f32 to vector<8x1xf32>
    %360 = arith.divf %358, %359 : vector<8x1xf32>
    %361 = vector.broadcast %351 : vector<8x1xf32> to vector<8x32xf32>
    %362 = arith.subf %343, %361 : vector<8x32xf32>
    %cst_190 = arith.constant 9.99999974E-6 : f32
    %363 = vector.broadcast %cst_190 : f32 to vector<8x1xf32>
    %364 = arith.addf %360, %363 : vector<8x1xf32>
    %365 = math.rsqrt %364 : vector<8x1xf32>
    %366 = vector.broadcast %365 : vector<8x1xf32> to vector<8x32xf32>
    %367 = arith.mulf %362, %366 : vector<8x32xf32>
    %368 = vector.broadcast %345 : vector<1x32xf32> to vector<8x32xf32>
    %369 = arith.mulf %367, %368 : vector<8x32xf32>
    %370 = vector.broadcast %347 : vector<1x32xf32> to vector<8x32xf32>
    %371 = arith.addf %369, %370 : vector<8x32xf32>
    %c0_191 = arith.constant 0 : index
    %c0_192 = arith.constant 0 : index
    %c0_193 = arith.constant 0 : index
    %372 = vector.load %arg15[%c0_191, %c0_192, %c0_193] : memref<1x8x32xf32, #tpu.memory_space<vmem>>, vector<1x8x32xf32>
    %373 = vector.shape_cast %372 : vector<1x8x32xf32> to vector<8x32xf32>
    %374 = vector.shape_cast %371 : vector<8x32xf32> to vector<1x8x32xf32>
    tpu.vector_store %arg15[%c0_191, %c0_192, %c0_193], %374 {strides = array<i32>} : memref<1x8x32xf32, #tpu.memory_space<vmem>>, vector<1x8x32xf32>,
    return
  }
  func.func @transform_0(%arg0: i32, %arg1: memref<2xi32, #tpu.memory_space<smem>>) -> (i32, i32, i32) {
    %c0_i32 = arith.constant 0 : i32
    %c0_i32_0 = arith.constant 0 : i32
    %c0_i32_1 = arith.constant 0 : i32
    return %arg0, %c0_i32, %c0_i32_0 : i32, i32, i32
  }
  func.func @transform_1(%arg0: i32, %arg1: memref<2xi32, #tpu.memory_space<smem>>) -> (i32, i32) {
    %c0_i32 = arith.constant 0 : i32
    %c0_i32_0 = arith.constant 0 : i32
    %c0_i32_1 = arith.constant 0 : i32
    return %c0_i32, %c0_i32_0 : i32, i32
  }
  func.func @transform_2(%arg0: i32, %arg1: memref<2xi32, #tpu.memory_space<smem>>) -> (i32, i32) {
    %c0_i32 = arith.constant 0 : i32
    %c0_i32_0 = arith.constant 0 : i32
    %c0_i32_1 = arith.constant 0 : i32
    return %c0_i32, %c0_i32_0 : i32, i32
  }
  func.func @transform_3(%arg0: i32, %arg1: memref<2xi32, #tpu.memory_space<smem>>) -> (i32, i32) {
    %c0_i32 = arith.constant 0 : i32
    %c0_i32_0 = arith.constant 0 : i32
    %c0_i32_1 = arith.constant 0 : i32
    return %c0_i32, %c0_i32_0 : i32, i32
  }
  func.func @transform_4(%arg0: i32, %arg1: memref<2xi32, #tpu.memory_space<smem>>) -> (i32, i32) {
    %c0_i32 = arith.constant 0 : i32
    %c0_i32_0 = arith.constant 0 : i32
    %c0_i32_1 = arith.constant 0 : i32
    return %c0_i32, %c0_i32_0 : i32, i32
  }
  func.func @transform_5(%arg0: i32, %arg1: memref<2xi32, #tpu.memory_space<smem>>) -> (i32, i32, i32) {
    %c0_i32 = arith.constant 0 : i32
    %c0_i32_0 = arith.constant 0 : i32
    %c0_i32_1 = arith.constant 0 : i32
    %c0_i32_2 = arith.constant 0 : i32
    return %c0_i32, %c0_i32_0, %c0_i32_1 : i32, i32, i32
  }
  func.func @transform_6(%arg0: i32, %arg1: memref<2xi32, #tpu.memory_space<smem>>) -> (i32, i32, i32) {
    %c0_i32 = arith.constant 0 : i32
    %c0_i32_0 = arith.constant 0 : i32
    %c0_i32_1 = arith.constant 0 : i32
    %c0_i32_2 = arith.constant 0 : i32
    return %c0_i32, %c0_i32_0, %c0_i32_1 : i32, i32, i32
  }
  func.func @transform_7(%arg0: i32, %arg1: memref<2xi32, #tpu.memory_space<smem>>) -> (i32, i32, i32) {
    %c0_i32 = arith.constant 0 : i32
    %c0_i32_0 = arith.constant 0 : i32
    %c0_i32_1 = arith.constant 0 : i32
    %c0_i32_2 = arith.constant 0 : i32
    return %c0_i32, %c0_i32_0, %c0_i32_1 : i32, i32, i32
  }
  func.func @transform_8(%arg0: i32, %arg1: memref<2xi32, #tpu.memory_space<smem>>) -> (i32, i32, i32) {
    %c0_i32 = arith.constant 0 : i32
    %c0_i32_0 = arith.constant 0 : i32
    %c0_i32_1 = arith.constant 0 : i32
    %c0_i32_2 = arith.constant 0 : i32
    return %c0_i32, %c0_i32_0, %c0_i32_1 : i32, i32, i32
  }
  func.func @transform_9(%arg0: i32, %arg1: memref<2xi32, #tpu.memory_space<smem>>) -> (i32, i32, i32) {
    %c0_i32 = arith.constant 0 : i32
    %c0_i32_0 = arith.constant 0 : i32
    %c0_i32_1 = arith.constant 0 : i32
    %c0_i32_2 = arith.constant 0 : i32
    return %c0_i32, %c0_i32_0, %c0_i32_1 : i32, i32, i32
  }
  func.func @transform_10(%arg0: i32, %arg1: memref<2xi32, #tpu.memory_space<smem>>) -> (i32, i32, i32) {
    %c0_i32 = arith.constant 0 : i32
    %c0_i32_0 = arith.constant 0 : i32
    %c0_i32_1 = arith.constant 0 : i32
    %c0_i32_2 = arith.constant 0 : i32
    return %c0_i32, %c0_i32_0, %c0_i32_1 : i32, i32, i32
  }
  func.func @transform_11(%arg0: i32, %arg1: memref<2xi32, #tpu.memory_space<smem>>) -> (i32, i32, i32) {
    %c0_i32 = arith.constant 0 : i32
    %c0_i32_0 = arith.constant 0 : i32
    %c0_i32_1 = arith.constant 0 : i32
    %c0_i32_2 = arith.constant 0 : i32
    return %c0_i32, %c0_i32_0, %c0_i32_1 : i32, i32, i32
  }
  func.func @transform_12(%arg0: i32, %arg1: memref<2xi32, #tpu.memory_space<smem>>) -> (i32, i32, i32) {
    %c0_i32 = arith.constant 0 : i32
    %c0_i32_0 = arith.constant 0 : i32
    %c0_i32_1 = arith.constant 0 : i32
    %c0_i32_2 = arith.constant 0 : i32
    return %c0_i32, %c0_i32_0, %c0_i32_1 : i32, i32, i32
  }
  func.func @transform_13(%arg0: i32, %arg1: memref<2xi32, #tpu.memory_space<smem>>) -> (i32, i32, i32) {
    %c0_i32 = arith.constant 0 : i32
    %c0_i32_0 = arith.constant 0 : i32
    %c0_i32_1 = arith.constant 0 : i32
    return %arg0, %c0_i32, %c0_i32_0 : i32, i32, i32
  }
  func.func @transform_14(%arg0: i32, %arg1: memref<2xi32, #tpu.memory_space<smem>>) -> (i32, i32, i32, i32, i32) {
    %c0_i32 = arith.constant 0 : i32
    %c0_i32_0 = arith.constant 0 : i32
    %c0_i32_1 = arith.constant 0 : i32
    %c0_i32_2 = arith.constant 0 : i32
    %c0_i32_3 = arith.constant 0 : i32
    return %arg0, %c0_i32, %c0_i32_0, %c0_i32_1, %c0_i32_2 : i32, i32, i32, i32, i32
  }
}

</mosaic_0001>

<bundles_post_ra>
// kernel: tpu_custom_call.1
= control target key start
LH: loop header
LB: loop body
LE: loop exit
PB: predicated region body
PF: predicated region fallthrough
CT: control target
= control target key end

     0   :  { %s2387_s21 = smov [#allocation3]   ;;  %s3004_s0 = inlined_call_operand.hbm [shape: s32[2], index: 0, kind: input, shape index: {}]   ;;  %s3005_s1 = inlined_call_operand.hbm [shape: f32[2,8,16], index: 1, kind: input, shape index: {}]   ;;  %s3006_s2 = inlined_call_operand.hbm [shape: f32[16,32], index: 2, kind: input, shape index: {}]   ;;  %s3007_s3 = inlined_call_operand.hbm [shape: f32[1,32], index: 3, kind: input, shape index: {}]   ;;  %s3008_s4 = inlined_call_operand.hbm [shape: f32[1,32], index: 4, kind: input, shape index: {}]   ;;  %s3009_s5 = inlined_call_operand.hbm [shape: f32[8,32], index: 5, kind: input, shape index: {}]   ;;  %s3010_s6 = inlined_call_operand.vmem [shape: f32[2,32,96], index: 6, kind: input, shape index: {}]   ;;  %s3011_s7 = inlined_call_operand.vmem [shape: f32[2,32,32], index: 7, kind: input, shape index: {}]   ;;  %s3012_s8 = inlined_call_operand.vmem [shape: f32[2,1,32], index: 8, kind: input, shape index: {}]   ;;  %s3013_s9 = inlined_call_operand.vmem [shape: f32[2,1,32], index: 9, kind: input, shape index: {}]   ;;  %s3014_s10 = inlined_call_operand.vmem [shape: f32[2,32,64], index: 10, kind: input, shape index: {}]   ;;  %s3015_s11 = inlined_call_operand.vmem [shape: f32[2,64,32], index: 11, kind: input, shape index: {}]   ;;  %s3016_s12 = inlined_call_operand.vmem [shape: f32[2,1,32], index: 12, kind: input, shape index: {}]   ;;  %s3017_s13 = inlined_call_operand.vmem [shape: f32[2,1,32], index: 13, kind: input, shape index: {}]   ;;  %s3018_s14 = inlined_call_operand.hbm [shape: f32[2,8,32], index: 14, kind: output, shape index: {0}]   ;;  %s3019_s15 = inlined_call_operand.hbm [shape: f32[2,2,4,8,8], index: 15, kind: output, shape index: {1}]  }
   0x1   :  { %3033 = sst [smem:[#allocation26_spill]] %s3005_s1  ;;  %s22_s20 = sshll.u32 %s3004_s0, 4  ;;  %s23_s20 = int_to_ptr.hbm [resolvable:$true] %s22_s20 }
   0x2   :  { %3034 = sst [smem:[#allocation27_spill]] %s3006_s2 }
   0x3   :  { %3035 = sst [smem:[#allocation28_spill]] %s3007_s3 }
   0x4   :  { %3036 = sst [smem:[#allocation29_spill]] %s3008_s4 }
   0x5   :  { %3037 = sst [smem:[#allocation30_spill]] %s3009_s5 }
   0x6   :  { %3038 = sst [smem:[#allocation31_spill]] %s3018_s14 }
   0x7   :  { %25 = dma.hbm_to_smem %s23_s20, 16, %s2387_s21, [#allocation2] }
   0x8   :  { %2349 = dma.done.wait [#allocation2], 16 }
   0x9   :  { %2350 = vsyncadd [#allocation2], 4294967280 }
   0xa   :  { %28 = sfence }
   0xb   :  { %29 = vsyncpa [#allocation5], 0 }
   0xc   :  { %31 = vsyncpa [#allocation5 + $0x1], 0 }
   0xd   :  { %32 = vsyncpa [#allocation8], 0 }
   0xe   :  { %33 = vsyncpa [#allocation11], 0 }
   0xf   :  { %34 = vsyncpa [#allocation6], 0 }
  0x10   :  { %36 = vsyncpa [#allocation6 + $0x1], 0 }
  0x11   :  { %37 = vsyncpa [#allocation15], 0 }
  0x12   :  { %39 = vsyncpa [#allocation15 + $0x1], 0  ;;  %s2491_s22 = smov 0   ;;  %s2493_s23 = smov 0  }
  0x13   :  { %s2495_s24 = smov 0   ;;  %s2497_s0 = smov 0  }
  0x14 LB: > { %3039 = sst [smem:[#allocation22_spill]] %s2381_s24  ;;  %s2515_s28 = sadd.s32 4294967295, %s2385_s0   ;;  %s2385_s0 = sphi %s2497_s0, %s3068_s0   ;;  %s2381_s24 = sphi %s2495_s24, %s3070_s24   ;;  %s2377_s23 = sphi %s2493_s23, %s3072_s23   ;;  %s2373_s22 = sphi %s2491_s22, %s3071_s22  }
  0x15   : > { %s3040_s2 = sld [smem:[#allocation27_spill]]  ;;  %p1861_p0 = scmp.ge.s32.totalorder %s2385_s0, 1 }
  0x16   : > { %p66_p1 = scmp.eq.s32.totalorder %s2515_s28, 0  ;;  %p380_p2 = scmp.lt.s32.totalorder %s2385_s0, 3 }
  0x17   : > { %s2388_s30 = smov [#allocation7]   ;;  %s3042_s4 = sld [smem:[#allocation29_spill]] }
  0x18   : > { %p2520_p3 = pnand %p1861_p0, %p380_p2  ;;  %s393_s16 = sshll.u32 %s2388_s30, 4  ;;  %s394_s16 = int_to_ptr.vmem [resolvable:$true] %s393_s16 }
  0x19   : > { %s3044_s3 = sld [smem:[#allocation28_spill]]  ;;  %s2389_s30 = smov [#allocation10]  }
  0x1a   : > { %p1977_p4 = pneg %p2520_p3  ;;  %s2390_s14 = smov 128  }
  0x1b   : > { %s391_s27 = sshll.u32 %s3040_s2, 4  ;;  %s420_s2 = sshll.u32 %s2389_s30, 4  ;;  %s392_s27 = int_to_ptr.hbm [resolvable:$true] %s391_s27  ;;  %s421_s2 = int_to_ptr.vmem [resolvable:$true] %s420_s2 }
  0x1c   : > { %p2532_p6 = pnand %p1977_p4, %p66_p1  ;;  %s2391_s17 = smov 8  }
  0x1d   : > { %s418_s19 = sshll.u32 %s3042_s4, 4  ;;  %s3045_s5 = sld [smem:[#allocation30_spill]]  ;;  %s419_s19 = int_to_ptr.hbm [resolvable:$true] %s418_s19 }
  0x1e   : > { %1980 = dma.hbm_to_vmem [thread:$0]  (!%p2532_p6), %s392_s27, 256, %s394_s16, [#allocation8], %s2390_s14, %s2390_s14, %s2391_s17  }
  0x1f   : > { %s406_s26 = sshll.u32 %s3044_s3, 4  ;;  %s2392_s25 = smov [#allocation9]   ;;  %s407_s26 = int_to_ptr.hbm [resolvable:$true] %s406_s26 }
  0x20   : > { %1986 = dma.hbm_to_vmem [thread:$0]  (!%p2532_p6), %s419_s19, 16, %s421_s2, [#allocation11]  }
  0x21   : > { %s408_s30 = sshll.u32 %s2392_s25, 4  ;;  %s2393_s14 = smov [#allocation12]   ;;  %s409_s30 = int_to_ptr.vmem [resolvable:$true] %s408_s30 }
  0x22   : > { %1983 = dma.hbm_to_vmem [thread:$0]  (!%p2532_p6), %s407_s26, 16, %s409_s30, [#allocation8]  }
  0x23   : > { %s430_s21 = sshll.u32 %s3045_s5, 4  ;;  %s432_s2 = sshll.u32 %s2393_s14, 4  ;;  %s431_s21 = int_to_ptr.hbm [resolvable:$true] %s430_s21  ;;  %s433_s2 = int_to_ptr.vmem [resolvable:$true] %s432_s2 }
  0x24   : > { %1989 = dma.hbm_to_vmem [thread:$0]  (!%p2532_p6), %s431_s21, 128, %s433_s2, [#allocation11]  }
  0x25   : > { %s1860_s4 = sadd.s32 4294967294, %s2385_s0   ;;  %s2552_s27 = sadd.s32 1, %s2385_s0  }
  0x26   : > { %3046 = sst [smem:[#allocation23_spill]] %s2552_s27  ;;  %s49_s16 = ssub.s32 %s2385_s0, %s2552_s27 }
  0x27   : > { %s52_s19 = sadd.s32 1, %s2381_s24  ;;  %p50_p7 = scmp.eq.s32.totalorder %s49_s16, 0 }
  0x28   : > { %p59_p8 = scmp.ne.s32.totalorder %s2381_s24, %s2377_s23  ;;  %p60_p9 = scmp.eq.s32.totalorder %s2385_s0, 0 }
  0x29   : > { %p65_p10 = scmp.ne.s32.totalorder %s2377_s23, %s2373_s22  ;;  %p341_p13 = scmp.eq.s32.totalorder %s2515_s28, 1 }
  0x2a   : > { %s2563_s26 = scalar_select %p50_p7, %s2381_s24, %s52_s19  }
  0x2b   : > { %p2565_p11 = por %p60_p9, %p59_p8  ;;  %p2571_p12 = por %p66_p1, %p65_p10 }
  0x2c   : > { %3047 = sst [smem:[#allocation24_spill]] %s2563_s26  ;;  %p347_p0 = scmp.eq.s32.totalorder %s1860_s4, 1 }
  0x2d   : > { %p2005_p2 = scmp.lt.s32.totalorder %s2385_s0, 2  ;;  %s467_s18 = sand.u32 1, %s2381_s24  }
  0x2e   : > { %p2578_p4 = por %p341_p13, %p59_p8  ;;  %p2582_p6 = por %p347_p0, %p65_p10 }
  0x2f   : > { %s1867_s30 = sshll.u32 %s467_s18, 3  ;;  %s1868_s14 = sshll.u32 %s2385_s0, 3 }
  0x30   : > { %s3051_s25 = scalar_select %p2582_p6, 1, 0 }
  0x31   : > { %s3053_s1 = sld [smem:[#allocation26_spill]]  ;;  %s471_s3 = scalar_lea.vmem [#allocation4], %s1867_s30 }
  0x32   : > { %3052 = sst [smem:[#allocation25_spill]] %s3051_s25  ;;  %s479_s5 = sshll.u32 %s471_s3, 4  ;;  %s480_s5 = int_to_ptr.vmem [resolvable:$true] %s479_s5 }
  0x33   : > { %p2592_p7 = pnand %p2005_p2, %p2565_p11  ;;  %s468_s24 = scalar_lea.sflag [#allocation5], %s467_s18 }
  0x35   : > { %p2251_p9 = pneg %p2592_p7 }
  0x37   : > { %s475_s19 = scalar_lea.hbm %s3053_s1, %s1868_s14  ;;  %s2254_s14 = scalar_lea.hbm %s3053_s1, 16 }
  0x38   : > { %s477_s26 = sshll.u32 %s475_s19, 4  ;;  %s478_s26 = int_to_ptr.hbm [resolvable:$true] %s477_s26 }
  0x39   : > { %s2247_s27 = sshra.s32 %s478_s26, 4  ;;  %s2248_s27 = int_to_ptr.hbm [resolvable:$true] %s2247_s27 }
  0x3a   : > { %s2249_s25 = scalar_lea.hbm %s2248_s27, 8  ;;  %p2255_p11 = scmp.lt.s32.totalorder %s2248_s27, %s3053_s1 }
  0x3b   : > { %p2250_p8 = scmp.ne.s32.totalorder %s2248_s27, %s2249_s25  ;;  %p2256_p0 = scmp.lt.s32.totalorder %s2254_s14, %s2249_s25 }
  0x3d   : > { %p2252_p10 = pnand %p2251_p9, %p2250_p8  ;;  %p2257_p2 = por %p2256_p0, %p2255_p11 }
  0x3f   : > { %p2253_p13 = pneg %p2252_p10 }
  0x41   : > { %p2258_p5 = pnand %p2257_p2, %p2253_p13 }
  0x43   : > { %2261 = shalt.err (!%p2258_p5)
}
  0x44   : > { %1993 = dma.hbm_to_vmem [thread:$0]  (!%p2592_p7), %s478_s26, 128, %s480_s5, %s468_s24  }
  0x45   : > { %488 = sbr.rel (%p2520_p3) target bundleno = 4711 (0x1267), region = 72  ;;  %s2609_s18 = sand.u32 (!%p2520_p3), 1, %s2377_s23  }
  0x46   : > { %s1870_s16 = sshll.u32 (!%p2520_p3), %s2609_s18, 3  ;;  %s491_s19 = scalar_lea.sflag (!%p2520_p3), [#allocation5], %s2609_s18 }
  0x47   : > { %s494_s27 = scalar_lea.vmem (!%p2520_p3), [#allocation4], %s1870_s16 }
  0x4a   : > { %2352 = dma.done.wait (%p2571_p12), %s491_s19, 128  }
  0x4b   : > { %2354 = vsyncadd (%p2571_p12), %s491_s19, 4294967168 }
  0x4c   : > { %2356 = dma.done.wait (%p66_p1), [#allocation8], 272  }
  0x4d   : > { %2358 = vsyncadd (%p66_p1), [#allocation8], 4294967024 }
  0x4e   : > { %2360 = dma.done.wait (%p66_p1), [#allocation11], 144  }
  0x4f   : > { %2362 = vsyncadd (%p66_p1), [#allocation11], 4294967152  ;;  %v567_v0 = vld [vmem:[#allocation7 + $0x8] sm:$0xff]  ;;  %v566_v1 = vld [vmem:[#allocation7] sm:$0xff]  ;;  %vm572_vm0 = vcmask 130048   ;;  %vm598_vm1 = vcmask 261120   ;;  %v607_v23 = vlaneseq }
  0x50   : > { %590 = vmatpush.msra.mxu0 %v567_v0  ;;  %v565_v2 = vld [vmem:[%s494_s27] sm:$0xff]  ;;  %v619_v3 = vld [vmem:[%s3010_s6 + $0x18] sm:$0xff]  ;;  %v618_v4 = vld [vmem:[%s3010_s6 + $0x10] sm:$0xff]  ;;  %vm603_vm2 = vcmask 253952   ;;  %s2641_s3 = scalar_lea.vmem [#allocation13], %s1870_s16  ;;  %s3029_s14 = smov 88  }
  0x51   : > { %639 = vmatpush.msra.mxu1 %v619_v3  ;;  %v617_v5 = vld [vmem:[%s3010_s6 + $0x8] sm:$0xff]  ;;  %v616_v6 = vld [vmem:[%s3010_s6] sm:$0xff]  ;;  %s2395_s2 = smov 96   ;;  %s2396_s17 = smov 120   ;;  %vm650_vm3 = vcmask 64512   ;;  %v608_v24 = vand.u32 127, %v607_v23 }
  0x52   : > { %591 = vmatpush.msra.mxu0 %v566_v1  ;;  %v2064_v7 = vld [vmem:[#allocation9] ss:$0 sm:$0xff]  ;;  %v600_v8 = vld [vmem:[#allocation10] sm:$0x1]  ;;  %v601_v9 = vld [vmem:[#allocation12 + $0x7] sm:$0x1] }
  0x53   : > { %1877 = vmatmul.msk.f32.vlgmr.msra.gmra.mxu0 %vm572_vm0, %v565_v2  ;;  %640 = vmatpush.msra.mxu1 %v618_v4  ;;  %v596_v11 = vld [vmem:[#allocation12] sm:$0xff]  ;;  %v602_v13 = vadd.f32 %v601_v9, %v600_v8  ;;  %s2397_s16 = smov 80   ;;  %s3032_s19 = smov 112   ;;  %vm1092_vm11 = vcmask 523264  }
  0x54   : > { %s3030_s27 = smov 72   ;;  %s606_s5 = sld [smem:[#allocation3 + %s2515_s28]]  ;;  %v620_v41 = vld [vmem:[%s3011_s7] sm:$0xff]  ;;  %v621_v23 = vld [vmem:[%s3011_s7 + $0x8] sm:$0xff] }
  0x55   : > { %641 = vmatpush.msra.mxu1 %v617_v5  ;;  %s3031_s29 = smov 64   ;;  %s3028_s26 = smov 104  }
  0x56   : > { %s1876_s20 = sshll.u32 %s2609_s18, 6  ;;  %s1687_s4 = scalar_lea.sflag [#allocation15], %s2609_s18 }
  0x57   : > { %642 = vmatpush.msra.mxu1 %v616_v6  ;;  %s2683_s25 = scalar_lea.vmem [#allocation14], %s1876_s20  ;;  %s3027_s20 = smov 56  }
  0x5a   : > { %p611_p1 = scmp.gt.s32.totalorder %s606_s5, 1  ;;  %v609_v25 = vstv %s606_s5  ;;  %s3025_s5 = smov 40  }
  0x5b   : > { %vm610_vm4 = vcmp.lt.s32.totalorder %v608_v24, %v609_v25  ;;  %v622_v24 = vld [vmem:[%s3011_s7 + $0x10] sm:$0xff] }
  0x5c   : > { %s612_s24 = scalar_select %p611_p1, 1, 0 }
  0x5e   : > { %v613_v26 = vstv %s612_s24  ;;  %s3026_s24 = smov 48  }
  0x5f   : > { %vm614_vm5 = vcmp.eq.s32.totalorder %v613_v26, 1 }
  0x60   : > { %vm2670_vm6 = vmand %vm610_vm4, %vm614_vm5 }
  0xd0   : > { %v593_v10 = vpop.f32.mrf.mxu0 }
  0xd1   : > { %v594_v12 = vadd.f32 %v2064_v7, %v593_v10 }
  0xd3   : > { %v597_v14 = vadd.f32 %v596_v11, %v594_v12 }
  0xd5   : > { %599 = vst.msk [vmem:[%s2641_s3] sm:$0xff] %vm598_vm1, %v597_v14 }
  0xd6   : > { %604 = vst.msk [vmem:[%s2641_s3 + $0x7] sm:$0x1] %vm603_vm2, %v602_v13 }
  0xdd   : > { %v2647_v15 = vld [vmem:[%s2641_s3] sm:$0xff] }
  0xde   : > { %1878 = vmatmul.msk.f32.vlgmr.msra.gmra.mxu1 %vm598_vm1, %v2647_v15 }
 0x15b   : > { %v2651_v16 = vpop.f32.mrf.mxu1 }
 0x15c   : > { %717 = vrot.lane.b32.xlu2 %v2651_v16, %s3029_s14  ;;  %648 = vrot.lane.b32.xlu0 %v2651_v16, %s2395_s2  ;;  %s3062_s14 = smov 56  }
 0x164   : > { %715 = vrot.lane.b32.xlu2 %v2651_v16, %s2396_s17 }
 0x16c   : > { %832 = vrot.lane.b32.xlu2 %v2651_v16, %s2397_s16 }
 0x174   : > { %830 = vrot.lane.b32.xlu2 %v2651_v16, %s3032_s19  ;;  %s3064_s19 = smov 40  }
 0x17c   : > { %925 = vrot.lane.b32.xlu2 %v2651_v16, %s3030_s27  ;;  %s3063_s27 = smov 48  }
 0x1b6   : > { %v718_v17 = vpop.permute.xlu2 %717 }
 0x1be   : > { %v716_v18 = vpop.permute.xlu2 %715 }
 0x1c6   : > { %v833_v19 = vpop.permute.xlu2 %832 }
 0x1ce   : > { %v831_v20 = vpop.permute.xlu2 %830  ;;  %v649_v21 = vpop.permute.xlu0 %648 }
 0x1cf   : > { %1879 = vmatpush.xpose.msk.msra.mxu2 %vm650_vm3, %v649_v21  ;;  %v623_v21 = vld [vmem:[%s3011_s7 + $0x18] sm:$0xff] }
 0x1d2   : > { %1880 = vmatmul.msk.f32.vlgmr.msra.gmra.mxu2 %vm650_vm3, %v2651_v16 }
 0x1d3   : > { %802 = vmatpush.msrb.mxu2 %v621_v23  ;;  %v1901_v23 = vld [vmem:[%s3010_s6 + $0x28] sm:$0xff] }
 0x1d5   : > { %917 = vmatpush.msra.mxu2 %v622_v24  ;;  %v1900_v24 = vld [vmem:[%s3010_s6 + $0x20] sm:$0xff] }
 0x1d6   : > { %v926_v22 = vpop.permute.xlu2 %925 }
 0x1d7   : > { %1893 = vmatpush.xpose.msk.msrb.mxu1 %vm650_vm3, %v926_v22 }
 0x255   : > { %v672_v27 = vpop.f32.mrf.mxu2 }
 0x256   : > { %v675_v29 = vmul.f32 0.35355338, %v672_v27 }
 0x258   : > { %v676_v30 = vsel %vm2670_vm6, -1e+09, %v675_v29 }
 0x259   : > { %v677_v31 = vsel %vm650_vm3, %v676_v30, -inf }
 0x25a   : > { %678 = vmax.xlane.f32.xlu0 %v677_v31 }
 0x2cd   : > { %v679_v32 = vpop.xlane.xlu0 %678 }
 0x2ce   : > { %v680_v33 = vsub.f32 %v676_v30, %v679_v32 }
 0x2d0   : > { %v681_v34 = vmul.f32 1.442695, %v680_v33 }
 0x2d2   : > { %2073 = vpow2.f32 %v681_v34 }
 0x2d8   : > { %v2074_v35 = vpop.eup %2073 }
 0x2d9   : > { %v683_v36 = vsel %vm650_vm3, %v2074_v35, 0.0 }
 0x2da   : > { %684 = vadd.xlane.f32.xlu1 %v683_v36  ;;  %v2405_v36 = vmov 32.0  }
 0x2f3   : > { %689 = vrot.lane.b32.xlu1 %v2651_v16, %s3031_s29 }
 0x2fb   : > { %923 = vrot.lane.b32.xlu1 %v2651_v16, %s3028_s26  ;;  %s3057_s26 = smov 112  }
 0x34d   : > { %v685_v37 = vpop.xlane.xlu1 %684 }
 0x34e   : > { %2075 = vrcp.f32 %v685_v37 }
 0x354   : > { %v2076_v38 = vpop.eup %2075 }
 0x355   : > { %v687_v39 = vmul.f32 %v2076_v38, %v2074_v35 }
 0x357   : > { %688 = vst.msk [vmem:[%s2683_s25] sm:$0xff] %vm650_vm3, %v687_v39 }
 0x365   : > { %v690_v40 = vpop.permute.xlu1 %689 }
 0x366   : > { %710 = vmatpush.msra.mxu3 %v690_v40 }
 0x367   : > { %1881 = vmatmul.msk.f32.vlgmr.msra.gmra.mxu3 %vm650_vm3, %v687_v39 }
 0x368   : > { %1882 = vmatpush.xpose.msk.msrb.mxu3 %vm650_vm3, %v718_v17 }
 0x36c   : > { %825 = vmatpush.msra.mxu3 %v620_v41 }
 0x36d   : > { %v924_v42 = vpop.permute.xlu1 %923 }
 0x36e   : > { %1894 = vmatmul.msk.f32.vlgmr.msrb.gmra.mxu1 %vm650_vm3, %v924_v42 }
 0x36f   : > { %1883 = vmatmul.msk.f32.vlgmr.msrb.gmra.mxu3 %vm650_vm3, %v716_v18 }
 0x370   : > { %1888 = vmatpush.xpose.msk.msrb.mxu3 %vm650_vm3, %v833_v19 }
 0x3ea   : > { %v712_v43 = vpop.f32.mrf.mxu3 }
 0x3eb   : > { %1887 = vmatmul.msk.f32.vlgmr.msra.gmra.mxu3 %vm650_vm3, %v712_v43  ;;  %v948_v44 = vpop.f32.mrf.mxu1 }
 0x3ec   : > { %v951_v45 = vmul.f32 0.35355338, %v948_v44 }
 0x3ee   : > { %v952_v46 = vsel %vm2670_vm6, -1e+09, %v951_v45 }
 0x3ef   : > { %v953_v47 = vsel %vm650_vm3, %v952_v46, -inf }
 0x3f0   : > { %954 = vmax.xlane.f32.xlu0 %v953_v47  ;;  %v1059_v47 = vld [vmem:[%s3014_s10 + $0x18] sm:$0xff] }
 0x3f2   : > { %v740_v48 = vpop.f32.mrf.mxu3 }
 0x3f3   : > { %v743_v49 = vmul.f32 0.35355338, %v740_v48  ;;  %1889 = vmatmul.msk.f32.vlgmr.msrb.gmra.mxu3 %vm650_vm3, %v831_v20  ;;  %v1058_v48 = vld [vmem:[%s3014_s10 + $0x10] sm:$0xff] }
 0x3f5   : > { %v744_v50 = vsel %vm2670_vm6, -1e+09, %v743_v49  ;;  %v1057_v49 = vld [vmem:[%s3014_s10 + $0x8] sm:$0xff] }
 0x3f6   : > { %v745_v51 = vsel %vm650_vm3, %v744_v50, -inf }
 0x3f7   : > { %746 = vmax.xlane.f32.xlu2 %v745_v51  ;;  %v1091_v51 = vld [vmem:[%s3015_s11 + $0x38] sm:$0xff] }
 0x3f8   : > { %1104 = vmatpush.msra.mxu1 %v1091_v51 }
 0x463   : > { %v955_v52 = vpop.xlane.xlu0 %954 }
 0x464   : > { %v956_v53 = vsub.f32 %v952_v46, %v955_v52  ;;  %v1090_v52 = vld [vmem:[%s3015_s11 + $0x30] sm:$0xff] }
 0x465   : > { %1105 = vmatpush.msra.mxu1 %v1090_v52 }
 0x466   : > { %v957_v54 = vmul.f32 1.442695, %v956_v53  ;;  %v1089_v53 = vld [vmem:[%s3015_s11 + $0x28] sm:$0xff] }
 0x467   : > { %1106 = vmatpush.msra.mxu1 %v1089_v53 }
 0x468   : > { %2077 = vpow2.f32 %v957_v54 }
 0x46a   : > { %v747_v55 = vpop.xlane.xlu2 %746 }
 0x46b   : > { %v748_v56 = vsub.f32 %v744_v50, %v747_v55  ;;  %v1056_v50 = vld [vmem:[%s3014_s10] sm:$0xff] }
 0x46d   : > { %v749_v57 = vmul.f32 1.442695, %v748_v56  ;;  %v1088_v56 = vld [vmem:[%s3015_s11 + $0x20] sm:$0xff] }
 0x46e   : > { %v2078_v58 = vpop.eup %2077  ;;  %v827_v59 = vpop.f32.mrf.mxu3  ;;  %1107 = vmatpush.msra.mxu1 %v1088_v56 }
 0x46f   : > { %2079 = vpow2.f32 %v749_v57  ;;  %v959_v60 = vsel %vm650_vm3, %v2078_v58, 0.0 }
 0x470   : > { %960 = vadd.xlane.f32.xlu2 %v959_v60 }
 0x475   : > { %v2080_v61 = vpop.eup %2079 }
 0x476   : > { %v855_v62 = vpop.f32.mrf.mxu3  ;;  %v751_v63 = vsel %vm650_vm3, %v2080_v61, 0.0 }
 0x477   : > { %v858_v0 = vmul.f32 0.35355338, %v855_v62  ;;  %752 = vadd.xlane.f32.xlu0 %v751_v63 }
 0x479   : > { %v859_v1 = vsel %vm2670_vm6, -1e+09, %v858_v0 }
 0x47a   : > { %v860_v2 = vsel %vm650_vm3, %v859_v1, -inf }
 0x47b   : > { %861 = vmax.xlane.f32.xlu1 %v860_v2  ;;  %v2065_v2 = vld [vmem:[%s3012_s8] ss:$0 sm:$0xff] }
 0x488   : > { %966 = vrot.lane.b32.xlu2 %v2651_v16, %s3025_s5 }
 0x494   : > { %873 = vrot.lane.b32.xlu1 %v2651_v16, %s3026_s24  ;;  %s3060_s24 = smov 88  }
 0x4e3   : > { %v961_v3 = vpop.xlane.xlu2 %960 }
 0x4e4   : > { %2081 = vrcp.f32 %v961_v3 }
 0x4ea   : > { %v2082_v4 = vpop.eup %2081  ;;  %v753_v5 = vpop.xlane.xlu0 %752 }
 0x4eb   : > { %v963_v6 = vmul.f32 %v2082_v4, %v2078_v58  ;;  %2083 = vrcp.f32 %v753_v5  ;;  %v967_v7 = vpop.permute.xlu2 %966  ;;  %v1087_v58 = vld [vmem:[%s3015_s11 + $0x18] sm:$0xff]  ;;  %v2066_v5 = vld [vmem:[%s3013_s9] ss:$0 sm:$0xff] }
 0x4ec   : > { %987 = vmatpush.msra.mxu3 %v967_v7  ;;  %1108 = vmatpush.msra.mxu1 %v1087_v58 }
 0x4ed   : > { %1895 = vst.msk [vmem:[%s2683_s25 + $0x18] sm:$0xff] %vm650_vm3, %v963_v6  ;;  %1896 = vmatmul.msk.f32.vlgmr.msra.gmra.mxu3 %vm650_vm3, %v963_v6 }
 0x4ee   : > { %v862_v8 = vpop.xlane.xlu1 %861 }
 0x4ef   : > { %v863_v9 = vsub.f32 %v859_v1, %v862_v8  ;;  %v1085_v8 = vld [vmem:[%s3015_s11 + $0x8] sm:$0xff] }
 0x4f1   : > { %v2084_v10 = vpop.eup %2083  ;;  %v864_v11 = vmul.f32 1.442695, %v863_v9  ;;  %v1084_v9 = vld [vmem:[%s3015_s11] sm:$0xff] }
 0x4f2   : > { %v755_v12 = vmul.f32 %v2084_v10, %v2080_v61 }
 0x4f3   : > { %2085 = vpow2.f32 %v864_v11 }
 0x4f4   : > { %1884 = vst.msk [vmem:[%s2683_s25 + $0x8] sm:$0xff] %vm650_vm3, %v755_v12 }
 0x4f9   : > { %v2086_v13 = vpop.eup %2085 }
 0x4fa   : > { %v866_v14 = vsel %vm650_vm3, %v2086_v13, 0.0 }
 0x4fb   : > { %867 = vadd.xlane.f32.xlu0 %v866_v14 }
 0x506   : > { %v874_v22 = vpop.permute.xlu1 %873 }
 0x50f   : > { %758 = vrot.lane.b32.xlu0 %v2651_v16, %s3027_s20  ;;  %s3061_s20 = smov 104  }
 0x56e   : > { %v868_v17 = vpop.xlane.xlu0 %867 }
 0x56f   : > { %2087 = vrcp.f32 %v868_v17 }
 0x570   : > { %v989_v16 = vpop.f32.mrf.mxu3  ;;  %2089 = vrcp.f32 %v2405_v36 }
 0x575   : > { %v2088_v18 = vpop.eup %2087 }
 0x576   : > { %v870_v19 = vmul.f32 %v2088_v18, %v2086_v13  ;;  %v2090_v37 = vpop.eup %2089 }
 0x577   : > { %v1023_v38 = vmul.f32 32.0, %v2090_v37  ;;  %vm1027_vm7 = vweird.f32 %v2090_v37 }
 0x578   : > { %1890 = vst.msk [vmem:[%s2683_s25 + $0x10] sm:$0xff] %vm650_vm3, %v870_v19 }
 0x579   : > { %v1024_v39 = vsub.f32 1.0, %v1023_v38  ;;  %v2068_v38 = vld [vmem:[%s3017_s13] ss:$0 sm:$0xff] }
 0x57b   : > { %v1025_v40 = vmul.f32 %v2090_v37, %v1024_v39 }
 0x57d   : > { %v1026_v41 = vadd.f32 %v2090_v37, %v1025_v40 }
 0x57f   : > { %v2738_v42 = vsel %vm1027_vm7, %v2090_v37, %v1026_v41 }
 0x581   : > { %v759_v20 = vpop.permute.xlu0 %758 }
 0x582   : > { %779 = vmatpush.msrb.mxu0 %v759_v20 }
 0x583   : > { %1885 = vmatmul.msk.f32.vlgmr.msrb.gmra.mxu0 %vm650_vm3, %v755_v12 }
 0x584   : > { %894 = vmatpush.msra.mxu0 %v874_v22  ;;  %v1903_v22 = vld [vmem:[%s3010_s6 + $0x38] sm:$0xff] }
 0x585   : > { %1173 = vmatpush.msrb.mxu3 %v1903_v22 }
 0x586   : > { %1010 = vmatpush.msrb.mxu0 %v623_v21 }
 0x58b   : > { %1891 = vmatmul.msk.f32.vlgmr.msra.gmra.mxu0 %vm650_vm3, %v870_v19 }
 0x593   : > { %1897 = vmatmul.msk.f32.vlgmr.msrb.gmra.mxu0 %vm650_vm3, %v989_v16  ;;  %v1902_v16 = vld [vmem:[%s3010_s6 + $0x30] sm:$0xff] }
 0x594   : > { %1174 = vmatpush.msrb.mxu3 %v1902_v16 }
 0x596   : > { %1175 = vmatpush.msrb.mxu3 %v1901_v23 }
 0x598   : > { %1176 = vmatpush.msrb.mxu3 %v1900_v24 }
 0x600   : > { %v781_v25 = vpop.f32.mrf.mxu0 }
 0x601   : > { %1886 = vmatmul.msk.f32.vlgmr.msrb.gmra.mxu2 %vm650_vm3, %v781_v25 }
 0x602   : > { %1075 = vmatpush.msrb.mxu2 %v1059_v47  ;;  %v1904_v47 = vld [vmem:[%s3011_s7 + $0x20] sm:$0xff] }
 0x604   : > { %1076 = vmatpush.msrb.mxu2 %v1058_v48 }
 0x606   : > { %1077 = vmatpush.msrb.mxu2 %v1057_v49 }
 0x608   : > { %v896_v26 = vpop.f32.mrf.mxu0  ;;  %1078 = vmatpush.msrb.mxu2 %v1056_v50 }
 0x609   : > { %1892 = vmatmul.msk.f32.vlgmr.msra.gmra.mxu2 %vm650_vm3, %v896_v26 }
 0x610   : > { %v1012_v32 = vpop.f32.mrf.mxu0 }
 0x684   : > { %v804_v27 = vpop.f32.mrf.mxu2 }
 0x685   : > { %v828_v29 = vadd.f32 %v827_v59, %v804_v27  ;;  %v1086_v59 = vld [vmem:[%s3015_s11 + $0x10] sm:$0xff] }
 0x686   : > { %1109 = vmatpush.msra.mxu1 %v1086_v59 }
 0x688   : > { %1110 = vmatpush.msra.mxu1 %v1085_v8 }
 0x68a   : > { %1111 = vmatpush.msra.mxu1 %v1084_v9 }
 0x68c   : > { %v919_v30 = vpop.f32.mrf.mxu2  ;;  %1359 = vmatpush.msrb.mxu1 %v1904_v47 }
 0x68d   : > { %v922_v31 = vadd.f32 %v919_v30, %v828_v29 }
 0x68f   : > { %v1015_v33 = vadd.f32 %v1012_v32, %v922_v31 }
 0x691   : > { %v1016_v34 = vadd.f32 %v1015_v33, %v2647_v15 }
 0x693   : > { %v1019_v35 = vsel %vm598_vm1, %v1016_v34, 0.0 }
 0x694   : > { %1020 = vadd.xlane.f32.xlu0 %v1019_v35  ;;  %v2067_v35 = vld [vmem:[%s3016_s12] ss:$0 sm:$0xff] }
 0x707   : > { %v1021_v43 = vpop.xlane.xlu0 %1020 }
 0x708   : > { %v1029_v44 = vmul.f32 %v2738_v42, %v1021_v43 }
 0x70a   : > { %v1030_v45 = vsub.f32 %v1016_v34, %v1029_v44 }
 0x70c   : > { %v1031_v46 = vmul.f32 %v1030_v45, %v1030_v45 }
 0x70e   : > { %v1032_v15 = vsel %vm598_vm1, %v1031_v46, 0.0 }
 0x70f   : > { %1033 = vadd.xlane.f32.xlu1 %v1032_v15 }
 0x782   : > { %v1034_v54 = vpop.xlane.xlu1 %1033 }
 0x783   : > { %v1035_v55 = vmul.f32 %v1034_v54, %v2738_v42 }
 0x785   : > { %v1036_v57 = vadd.f32 1e-05, %v1035_v55 }
 0x787   : > { %2091 = vrsqrt.f32 %v1036_v57  ;;  %vm1043_vm9 = vweird.f32 %v1036_v57 }
 0x78d   : > { %v2092_v60 = vpop.eup %2091 }
 0x78e   : > { %v1038_v61 = vmul.f32 %v2092_v60, %v1036_v57  ;;  %vm1044_vm8 = vweird.f32 %v2092_v60 }
 0x78f   : > { %vm1045_vm10 = vmor %vm1043_vm9, %vm1044_vm8 }
 0x790   : > { %v1039_v62 = vmul.f32 %v2092_v60, %v1038_v61 }
 0x792   : > { %v1040_v63 = vmul.f32 0.5, %v1039_v62 }
 0x794   : > { %v1041_v0 = vsub.f32 1.5, %v1040_v63 }
 0x796   : > { %v1042_v1 = vmul.f32 %v2092_v60, %v1041_v0 }
 0x798   : > { %v1046_v3 = vsel %vm1045_vm10, %v2092_v60, %v1042_v1 }
 0x799   : > { %v1047_v4 = vmul.f32 %v1046_v3, %v1030_v45 }
 0x79b   : > { %v1051_v6 = vmul.f32 %v2065_v2, %v1047_v4 }
 0x79d   : > { %v1055_v7 = vadd.f32 %v2066_v5, %v1051_v6 }
 0x79f   : > { %1898 = vmatmul.msk.f32.vlgmr.msrb.gmra.mxu2 %vm598_vm1, %v1055_v7 }
 0x822   : > { %v1080_v10 = vpop.f32.mrf.mxu2 }
 0x823   : > { %v1083_v11 = vmax.f32 %v1080_v10, 0.0 }
 0x825   : > { %1899 = vmatmul.msk.f32.vlgmr.msra.gmra.mxu1 %vm1092_vm11, %v1083_v11 }
 0x8a2   : > { %v1113_v12 = vpop.f32.mrf.mxu1 }
 0x8a3   : > { %v1114_v13 = vadd.f32 %v1113_v12, %v1055_v7 }
 0x8a5   : > { %v1118_v14 = vsel %vm598_vm1, %v1114_v13, 0.0 }
 0x8a6   : > { %1119 = vadd.xlane.f32.xlu2 %v1118_v14 }
 0x919   : > { %v1120_v17 = vpop.xlane.xlu2 %1119 }
 0x91a   : > { %v1121_v18 = vmul.f32 %v1120_v17, %v2738_v42 }
 0x91c   : > { %v1122_v19 = vsub.f32 %v1114_v13, %v1121_v18 }
 0x91e   : > { %v1123_v20 = vmul.f32 %v1122_v19, %v1122_v19 }
 0x920   : > { %v1124_v21 = vsel %vm598_vm1, %v1123_v20, 0.0 }
 0x921   : > { %1125 = vadd.xlane.f32.xlu0 %v1124_v21 }
 0x994   : > { %v1126_v25 = vpop.xlane.xlu0 %1125 }
 0x995   : > { %v1127_v26 = vmul.f32 %v1126_v25, %v2738_v42 }
 0x997   : > { %v1128_v27 = vadd.f32 1e-05, %v1127_v26 }
 0x999   : > { %2093 = vrsqrt.f32 %v1128_v27  ;;  %vm1135_vm13 = vweird.f32 %v1128_v27 }
 0x99f   : > { %v2094_v29 = vpop.eup %2093 }
 0x9a0   : > { %v1130_v30 = vmul.f32 %v2094_v29, %v1128_v27  ;;  %vm1136_vm12 = vweird.f32 %v2094_v29 }
 0x9a1   : > { %vm1137_vm14 = vmor %vm1135_vm13, %vm1136_vm12 }
 0x9a2   : > { %v1131_v31 = vmul.f32 %v2094_v29, %v1130_v30 }
 0x9a4   : > { %v1132_v32 = vmul.f32 0.5, %v1131_v31 }
 0x9a6   : > { %v1133_v33 = vsub.f32 1.5, %v1132_v32 }
 0x9a8   : > { %v1134_v34 = vmul.f32 %v2094_v29, %v1133_v33 }
 0x9aa   : > { %v1138_v36 = vsel %vm1137_vm14, %v2094_v29, %v1134_v34 }
 0x9ab   : > { %v1139_v37 = vmul.f32 %v1138_v36, %v1122_v19 }
 0x9ad   : > { %v1143_v39 = vmul.f32 %v2067_v35, %v1139_v37  ;;  %v1905_v37 = vld [vmem:[%s3011_s7 + $0x28] sm:$0xff] }
 0x9af   : > { %v2809_v40 = vadd.f32 %v2068_v38, %v1143_v39  ;;  %v1906_v38 = vld [vmem:[%s3011_s7 + $0x30] sm:$0xff] }
 0x9b1   : > { %1908 = vmatmul.msk.f32.vlgmr.msrb.gmra.mxu3 %vm598_vm1, %v2809_v40 }
 0xa34   : > { %v2813_v41 = vpop.f32.mrf.mxu3 }
 0xa35   : > { %1182 = vrot.lane.b32.xlu0 %v2813_v41, %s2395_s2  ;;  %s3058_s2 = smov 64  }
 0xa3d   : > { %1249 = vrot.lane.b32.xlu0 %v2813_v41, %s2396_s17  ;;  %s3059_s17 = smov 72  }
 0xa45   : > { %1366 = vrot.lane.b32.xlu0 %v2813_v41, %s2397_s16  ;;  %s2297_s16 = scalar_lea.hbm %s3019_s15, 128 }
 0xa4d   : > { %1364 = vrot.lane.b32.xlu0 %v2813_v41, %s3057_s26 }
 0xaa7   : > { %v1183_v43 = vpop.permute.xlu0 %1182 }
 0xaa8   : > { %1909 = vmatpush.xpose.msk.msra.mxu0 %vm650_vm3, %v1183_v43 }
 0xaab   : > { %1910 = vmatmul.msk.f32.vlgmr.msra.gmra.mxu0 %vm650_vm3, %v2813_v41 }
 0xaaf   : > { %v1250_v55 = vpop.permute.xlu0 %1249 }
 0xab7   : > { %v1367_v60 = vpop.permute.xlu0 %1366 }
 0xabf   : > { %v1365_v61 = vpop.permute.xlu0 %1364 }
 0xb28   : > { %v1205_v44 = vpop.f32.mrf.mxu0 }
 0xb29   : > { %v1208_v45 = vmul.f32 0.35355338, %v1205_v44 }
 0xb2b   : > { %v1209_v46 = vsel %vm2670_vm6, -1e+09, %v1208_v45 }
 0xb2c   : > { %v1210_v15 = vsel %vm650_vm3, %v1209_v46, -inf }
 0xb2d   : > { %1211 = vmax.xlane.f32.xlu1 %v1210_v15  ;;  %v1907_v15 = vld [vmem:[%s3011_s7 + $0x38] sm:$0xff] }
 0xb46   : > { %1223 = vrot.lane.b32.xlu1 %v2813_v41, %s3058_s2 }
 0xb4e   : > { %1459 = vrot.lane.b32.xlu1 %v2813_v41, %s3059_s17 }
 0xba0   : > { %v1212_v48 = vpop.xlane.xlu1 %1211 }
 0xba1   : > { %v1213_v49 = vsub.f32 %v1209_v46, %v1212_v48 }
 0xba3   : > { %v1214_v50 = vmul.f32 1.442695, %v1213_v49 }
 0xba5   : > { %2095 = vpow2.f32 %v1214_v50 }
 0xbab   : > { %v2096_v51 = vpop.eup %2095 }
 0xbac   : > { %v1216_v52 = vsel %vm650_vm3, %v2096_v51, 0.0 }
 0xbad   : > { %1217 = vadd.xlane.f32.xlu2 %v1216_v52 }
 0xbb8   : > { %v1224_v53 = vpop.permute.xlu1 %1223 }
 0xbb9   : > { %1244 = vmatpush.msra.mxu2 %v1224_v53 }
 0xbbb   : > { %1336 = vmatpush.msrb.mxu2 %v1905_v37 }
 0xbc0   : > { %v1460_v54 = vpop.permute.xlu1 %1459 }
 0xbc1   : > { %1924 = vmatpush.xpose.msk.msra.mxu1 %vm650_vm3, %v1460_v54 }
 0xbc5   : > { %1251 = vrot.lane.b32.xlu2 %v2813_v41, %s3060_s24  ;;  %s1954_s24 = sshll.u32 %s2515_s28, 6 }
 0xbcd   : > { %1457 = vrot.lane.b32.xlu2 %v2813_v41, %s3061_s20 }
 0xc20   : > { %v1218_v56 = vpop.xlane.xlu2 %1217 }
 0xc21   : > { %2097 = vrcp.f32 %v1218_v56 }
 0xc27   : > { %v2098_v57 = vpop.eup %2097 }
 0xc28   : > { %v1220_v58 = vmul.f32 %v2098_v57, %v2096_v51  ;;  %v1252_v59 = vpop.permute.xlu2 %1251 }
 0xc29   : > { %1913 = vmatpush.xpose.msk.msra.mxu3 %vm650_vm3, %v1252_v59 }
 0xc2a   : > { %1911 = vst.msk [vmem:[%s2683_s25 + $0x20] sm:$0xff] %vm650_vm3, %v1220_v58  ;;  %1912 = vmatmul.msk.f32.vlgmr.msra.gmra.mxu2 %vm650_vm3, %v1220_v58 }
 0xc2b   : > { %1451 = vmatpush.msra.mxu2 %v1906_v38 }
 0xc2c   : > { %1914 = vmatmul.msk.f32.vlgmr.msra.gmra.mxu3 %vm650_vm3, %v1250_v55 }
 0xc2d   : > { %1919 = vmatpush.xpose.msk.msrb.mxu3 %vm650_vm3, %v1367_v60 }
 0xc30   : > { %v1458_v3 = vpop.permute.xlu2 %1457 }
 0xc34   : > { %1920 = vmatmul.msk.f32.vlgmr.msrb.gmra.mxu3 %vm650_vm3, %v1365_v61  ;;  %v1934_v61 = vld [vmem:[%s3014_s10 + $0x38] sm:$0xff] }
 0xcad   : > { %v1246_v62 = vpop.f32.mrf.mxu2 }
 0xcae   : > { %1918 = vmatmul.msk.f32.vlgmr.msrb.gmra.mxu1 %vm650_vm3, %v1246_v62  ;;  %v1932_v62 = vld [vmem:[%s3014_s10 + $0x28] sm:$0xff] }
 0xcaf   : > { %v1274_v63 = vpop.f32.mrf.mxu3 }
 0xcb0   : > { %v1277_v0 = vmul.f32 0.35355338, %v1274_v63  ;;  %v1931_v63 = vld [vmem:[%s3014_s10 + $0x20] sm:$0xff] }
 0xcb2   : > { %v1278_v1 = vsel %vm2670_vm6, -1e+09, %v1277_v0  ;;  %v1943_v0 = vld [vmem:[%s3015_s11 + $0x78] sm:$0xff] }
 0xcb3   : > { %v1279_v2 = vsel %vm650_vm3, %v1278_v1, -inf  ;;  %1634 = vmatpush.msrb.mxu1 %v1943_v0 }
 0xcb4   : > { %1280 = vmax.xlane.f32.xlu0 %v1279_v2  ;;  %v1941_v2 = vld [vmem:[%s3015_s11 + $0x68] sm:$0xff] }
 0xcb6   : > { %1925 = vmatmul.msk.f32.vlgmr.msra.gmra.mxu1 %vm650_vm3, %v1458_v3 }
 0xcb7   : > { %v1389_v4 = vpop.f32.mrf.mxu3 }
 0xcb8   : > { %v1392_v5 = vmul.f32 0.35355338, %v1389_v4 }
 0xcba   : > { %v1393_v6 = vsel %vm2670_vm6, -1e+09, %v1392_v5  ;;  %v1940_v5 = vld [vmem:[%s3015_s11 + $0x60] sm:$0xff] }
 0xcbb   : > { %v1394_v7 = vsel %vm650_vm3, %v1393_v6, -inf }
 0xcbc   : > { %1395 = vmax.xlane.f32.xlu1 %v1394_v7  ;;  %v1939_v7 = vld [vmem:[%s3015_s11 + $0x58] sm:$0xff] }
 0xd27   : > { %v1281_v8 = vpop.xlane.xlu0 %1280 }
 0xd28   : > { %v1282_v9 = vsub.f32 %v1278_v1, %v1281_v8  ;;  %v1942_v1 = vld [vmem:[%s3015_s11 + $0x70] sm:$0xff] }
 0xd29   : > { %1635 = vmatpush.msrb.mxu1 %v1942_v1  ;;  %v1938_v8 = vld [vmem:[%s3015_s11 + $0x50] sm:$0xff] }
 0xd2a   : > { %v1283_v10 = vmul.f32 1.442695, %v1282_v9 }
 0xd2b   : > { %v2857_v11 = vpop.f32.mrf.mxu1  ;;  %1636 = vmatpush.msrb.mxu1 %v1941_v2 }
 0xd2c   : > { %2099 = vpow2.f32 %v1283_v10 }
 0xd2d   : > { %1637 = vmatpush.msrb.mxu1 %v1940_v5 }
 0xd2f   : > { %v1396_v12 = vpop.xlane.xlu1 %1395  ;;  %1638 = vmatpush.msrb.mxu1 %v1939_v7 }
 0xd30   : > { %v1397_v13 = vsub.f32 %v1393_v6, %v1396_v12 }
 0xd31   : > { %1639 = vmatpush.msrb.mxu1 %v1938_v8 }
 0xd32   : > { %v2100_v14 = vpop.eup %2099  ;;  %v1398_v17 = vmul.f32 1.442695, %v1397_v13 }
 0xd33   : > { %v1482_v18 = vpop.f32.mrf.mxu1  ;;  %v1285_v19 = vsel %vm650_vm3, %v2100_v14, 0.0 }
 0xd34   : > { %2101 = vpow2.f32 %v1398_v17  ;;  %v1485_v20 = vmul.f32 0.35355338, %v1482_v18  ;;  %1286 = vadd.xlane.f32.xlu0 %v1285_v19  ;;  %v2069_v17 = vld [vmem:[%s3012_s8 + $0x1] ss:$0 sm:$0xff] }
 0xd36   : > { %v1486_v21 = vsel %vm2670_vm6, -1e+09, %v1485_v20  ;;  %v2070_v20 = vld [vmem:[%s3013_s9 + $0x1] ss:$0 sm:$0xff] }
 0xd37   : > { %v1487_v22 = vsel %vm650_vm3, %v1486_v21, -inf }
 0xd38   : > { %1488 = vmax.xlane.f32.xlu2 %v1487_v22 }
 0xd3a   : > { %v2102_v16 = vpop.eup %2101 }
 0xd3b   : > { %v1400_v23 = vsel %vm650_vm3, %v2102_v16, 0.0 }
 0xd3c   : > { %1401 = vadd.xlane.f32.xlu1 %v1400_v23  ;;  %v1936_v23 = vld [vmem:[%s3015_s11 + $0x40] sm:$0xff] }
 0xd50   : > { %1292 = vrot.lane.b32.xlu2 %v2813_v41, %s3062_s14 }
 0xd55   : > { %1407 = vrot.lane.b32.xlu1 %v2813_v41, %s3063_s27  ;;  %s1712_s27 = scalar_lea.hbm %s3019_s15, %s1954_s24 }
 0xd56   : > { %s1715_s29 = sshll.u32 %s1712_s27, 4  ;;  %s1716_s29 = int_to_ptr.hbm [resolvable:$true] %s1715_s29 }
 0xd57   : > { %s2291_s30 = sshra.s32 %s1716_s29, 4  ;;  %s2292_s30 = int_to_ptr.hbm [resolvable:$true] %s2291_s30 }
 0xd58   : > { %s2293_s26 = scalar_lea.hbm %s2292_s30, 64  ;;  %p2298_p7 = scmp.lt.s32.totalorder %s2292_s30, %s3019_s15 }
 0xd59   : > { %p2294_p3 = scmp.ne.s32.totalorder %s2292_s30, %s2293_s26  ;;  %p2299_p8 = scmp.lt.s32.totalorder %s2297_s16, %s2293_s26 }
 0xd5b   : > { %p2295_p5 = pnand %p2294_p3, %p2578_p4  ;;  %p2300_p9 = por %p2299_p8, %p2298_p7 }
 0xd5d   : > { %p2296_p12 = pneg %p2295_p5 }
 0xd5f   : > { %p2301_p10 = pnand %p2300_p9, %p2296_p12 }
 0xda7   : > { %v1287_v24 = vpop.xlane.xlu0 %1286 }
 0xda8   : > { %2103 = vrcp.f32 %v1287_v24 }
 0xdab   : > { %v1489_v25 = vpop.xlane.xlu2 %1488 }
 0xdac   : > { %v1490_v26 = vsub.f32 %v1486_v21, %v1489_v25 }
 0xdae   : > { %v2104_v28 = vpop.eup %2103  ;;  %v1491_v27 = vmul.f32 1.442695, %v1490_v26 }
 0xdaf   : > { %v1289_v29 = vmul.f32 %v2104_v28, %v2100_v14  ;;  %v1402_v30 = vpop.xlane.xlu1 %1401 }
 0xdb0   : > { %2105 = vpow2.f32 %v1491_v27 }
 0xdb1   : > { %1915 = vst.msk [vmem:[%s2683_s25 + $0x28] sm:$0xff] %vm650_vm3, %v1289_v29  ;;  %2107 = vrcp.f32 %v1402_v30 }
 0xdb3   : > { %v1293_v31 = vpop.permute.xlu2 %1292 }
 0xdb4   : > { %1313 = vmatpush.msrb.mxu0 %v1293_v31 }
 0xdb5   : > { %1916 = vmatmul.msk.f32.vlgmr.msrb.gmra.mxu0 %vm650_vm3, %v1289_v29 }
 0xdb6   : > { %v2106_v32 = vpop.eup %2105 }
 0xdb7   : > { %v2108_v33 = vpop.eup %2107  ;;  %v1493_v34 = vsel %vm650_vm3, %v2106_v32, 0.0 }
 0xdb8   : > { %v1404_v35 = vmul.f32 %v2108_v33, %v2102_v16  ;;  %1494 = vadd.xlane.f32.xlu0 %v1493_v34  ;;  %v1937_v16 = vld [vmem:[%s3015_s11 + $0x48] sm:$0xff] }
 0xdb9   : > { %1640 = vmatpush.msrb.mxu1 %v1937_v16 }
 0xdba   : > { %1921 = vst.msk [vmem:[%s2683_s25 + $0x30] sm:$0xff] %vm650_vm3, %v1404_v35 }
 0xdbb   : > { %1641 = vmatpush.msrb.mxu1 %v1936_v23 }
 0xdc7   : > { %v1408_v36 = vpop.permute.xlu1 %1407 }
 0xdc8   : > { %1428 = vmatpush.msra.mxu0 %v1408_v36 }
 0xdc9   : > { %1922 = vmatmul.msk.f32.vlgmr.msra.gmra.mxu0 %vm650_vm3, %v1404_v35 }
 0xdca   : > { %1544 = vmatpush.msrb.mxu0 %v1907_v15 }
 0xdcc   : > { %1500 = vrot.lane.b32.xlu0 %v2813_v41, %s3064_s19  ;;  %s1713_s19 = sshll.u32 %s2683_s25, 4  ;;  %s1714_s19 = int_to_ptr.vmem [resolvable:$true] %s1713_s19 }
 0xe2b   : > { %v1495_v39 = vpop.xlane.xlu0 %1494 }
 0xe2c   : > { %2109 = vrcp.f32 %v1495_v39 }
 0xe32   : > { %v2110_v43 = vpop.eup %2109  ;;  %v1315_v44 = vpop.f32.mrf.mxu0 }
 0xe33   : > { %v1497_v45 = vmul.f32 %v2110_v43, %v2106_v32  ;;  %1917 = vmatmul.msk.f32.vlgmr.msrb.gmra.mxu2 %vm650_vm3, %v1315_v44 }
 0xe34   : > { %1605 = vmatpush.msrb.mxu2 %v1934_v61 }
 0xe35   : > { %1926 = vst.msk [vmem:[%s2683_s25 + $0x38] sm:$0xff] %vm650_vm3, %v1497_v45 }
 0xe3e   : > { %v1501_v41 = vpop.permute.xlu0 %1500 }
 0xe3f   : > { %1521 = vmatpush.msra.mxu3 %v1501_v41 }
 0xe40   : > { %1927 = vmatmul.msk.f32.vlgmr.msra.gmra.mxu3 %vm650_vm3, %v1497_v45 }
 0xe46   : > { %v1430_v46 = vpop.f32.mrf.mxu0 }
 0xe47   : > { %1923 = vmatmul.msk.f32.vlgmr.msra.gmra.mxu2 %vm650_vm3, %v1430_v46 }
 0xeb6   : > { %v1338_v48 = vpop.f32.mrf.mxu2 }
 0xeb7   : > { %v1362_v50 = vadd.f32 %v2857_v11, %v1338_v48 }
 0xec3   : > { %v1523_v47 = vpop.f32.mrf.mxu3 }
 0xec4   : > { %1928 = vmatmul.msk.f32.vlgmr.msrb.gmra.mxu0 %vm650_vm3, %v1523_v47 }
 0xeca   : > { %v1453_v49 = vpop.f32.mrf.mxu2 }
 0xecb   : > { %v1456_v51 = vadd.f32 %v1453_v49, %v1362_v50 }
 0xf41   : > { %v1546_v52 = vpop.f32.mrf.mxu0 }
 0xf42   : > { %v1549_v53 = vadd.f32 %v1546_v52, %v1456_v51 }
 0xf44   : > { %v1550_v54 = vadd.f32 %v1549_v53, %v2809_v40  ;;  %v1933_v40 = vld [vmem:[%s3014_s10 + $0x30] sm:$0xff] }
 0xf45   : > { %1606 = vmatpush.msrb.mxu2 %v1933_v40 }
 0xf46   : > { %v1555_v55 = vsel %vm598_vm1, %v1550_v54, 0.0 }
 0xf47   : > { %1556 = vadd.xlane.f32.xlu2 %v1555_v55  ;;  %1607 = vmatpush.msrb.mxu2 %v1932_v62 }
 0xf49   : > { %1608 = vmatpush.msrb.mxu2 %v1931_v63 }
 0xfba   : > { %v1557_v56 = vpop.xlane.xlu2 %1556 }
 0xfbb   : > { %v1558_v57 = vmul.f32 %v1557_v56, %v2738_v42 }
 0xfbd   : > { %v1559_v58 = vsub.f32 %v1550_v54, %v1558_v57 }
 0xfbf   : > { %v1560_v59 = vmul.f32 %v1559_v58, %v1559_v58 }
 0xfc1   : > { %v1561_v60 = vsel %vm598_vm1, %v1560_v59, 0.0 }
 0xfc2   : > { %1562 = vadd.xlane.f32.xlu0 %v1561_v60 }
0x1035   : > { %v1563_v3 = vpop.xlane.xlu0 %1562 }
0x1036   : > { %v1564_v4 = vmul.f32 %v1563_v3, %v2738_v42 }
0x1038   : > { %v1565_v6 = vadd.f32 1e-05, %v1564_v4 }
0x103a   : > { %2111 = vrsqrt.f32 %v1565_v6  ;;  %vm1572_vm0 = vweird.f32 %v1565_v6 }
0x1040   : > { %v2112_v9 = vpop.eup %2111 }
0x1041   : > { %v1567_v10 = vmul.f32 %v2112_v9, %v1565_v6  ;;  %vm1573_vm15 = vweird.f32 %v2112_v9 }
0x1042   : > { %vm1574_vm2 = vmor %vm1572_vm0, %vm1573_vm15 }
0x1043   : > { %v1568_v11 = vmul.f32 %v2112_v9, %v1567_v10 }
0x1045   : > { %v1569_v12 = vmul.f32 0.5, %v1568_v11 }
0x1047   : > { %v1570_v13 = vsub.f32 1.5, %v1569_v12 }
0x1049   : > { %v1571_v14 = vmul.f32 %v2112_v9, %v1570_v13 }
0x104b   : > { %v1575_v18 = vsel %vm1574_vm2, %v2112_v9, %v1571_v14 }
0x104c   : > { %v1576_v19 = vmul.f32 %v1575_v18, %v1559_v58 }
0x104e   : > { %v1580_v21 = vmul.f32 %v2069_v17, %v1576_v19 }
0x1050   : > { %v1584_v22 = vadd.f32 %v2070_v20, %v1580_v21 }
0x1052   : > { %1935 = vmatmul.msk.f32.vlgmr.msrb.gmra.mxu2 %vm598_vm1, %v1584_v22 }
0x10d5   : > { %v1610_v24 = vpop.f32.mrf.mxu2 }
0x10d6   : > { %v1613_v25 = vmax.f32 %v1610_v24, 0.0 }
0x10d8   : > { %1944 = vmatmul.msk.f32.vlgmr.msrb.gmra.mxu1 %vm1092_vm11, %v1613_v25 }
0x1155   : > { %v1643_v26 = vpop.f32.mrf.mxu1 }
0x1156   : > { %v1644_v28 = vadd.f32 %v1643_v26, %v1584_v22 }
0x1158   : > { %v1650_v27 = vsel %vm598_vm1, %v1644_v28, 0.0 }
0x1159   : > { %1651 = vadd.xlane.f32.xlu1 %v1650_v27 }
0x11cc   : > { %v1652_v29 = vpop.xlane.xlu1 %1651 }
0x11cd   : > { %v1653_v30 = vmul.f32 %v1652_v29, %v2738_v42 }
0x11cf   : > { %v1654_v31 = vsub.f32 %v1644_v28, %v1653_v30 }
0x11d1   : > { %v1655_v32 = vmul.f32 %v1654_v31, %v1654_v31 }
0x11d3   : > { %v1656_v33 = vsel %vm598_vm1, %v1655_v32, 0.0 }
0x11d4   : > { %1657 = vadd.xlane.f32.xlu2 %v1656_v33 }
0x11d5   : > { %2304 = shalt.err (!%p2301_p10)
}
0x11d6   : > { %s2406_s25 = smov 128   ;;  %s2407_s24 = smov 8   ;;  %v2071_v41 = vld [vmem:[%s3016_s12 + $0x1] ss:$0 sm:$0xff] }
0x11d7   : > { %1974 = dma.vmem_to_hbm [thread:$0]  (%p2578_p4), %s1714_s19, 1024, %s1716_s29, %s1687_s4, %s2406_s25, %s2406_s25, %s2407_s24  }
0x11d8   : > { %s1949_s1 = sshll.u32 %s2515_s28, 3  ;;  %s3065_s29 = sld [smem:[#allocation31_spill]]  ;;  %v2072_v46 = vld [vmem:[%s3017_s13 + $0x1] ss:$0 sm:$0xff] }
0x11d9   : > { %s1699_s28 = sshll.u32 %s2641_s3, 4  ;;  %s1682_s17 = scalar_lea.sflag [#allocation6], %s2609_s18  ;;  %s1700_s28 = int_to_ptr.vmem [resolvable:$true] %s1699_s28 }
0x11de   : > { %s1697_s4 = scalar_lea.hbm %s3065_s29, %s1949_s1  ;;  %s2325_s1 = scalar_lea.hbm %s3065_s29, 16 }
0x11df   : > { %s1701_s2 = sshll.u32 %s1697_s4, 4  ;;  %s1702_s2 = int_to_ptr.hbm [resolvable:$true] %s1701_s2 }
0x11e0   : > { %s2319_s16 = sshra.s32 %s1702_s2, 4  ;;  %s2320_s16 = int_to_ptr.hbm [resolvable:$true] %s2319_s16 }
0x11e1   : > { %s2321_s5 = scalar_lea.hbm %s2320_s16, 8  ;;  %p2326_p2 = scmp.lt.s32.totalorder %s2320_s16, %s3065_s29 }
0x11e2   : > { %p2322_p13 = scmp.ne.s32.totalorder %s2320_s16, %s2321_s5  ;;  %p2327_p1 = scmp.lt.s32.totalorder %s2325_s1, %s2321_s5 }
0x11e4   : > { %p2323_p11 = pnand %p2322_p13, %p2578_p4  ;;  %p2328_p3 = por %p2327_p1, %p2326_p2 }
0x11e6   : > { %p2324_p0 = pneg %p2323_p11 }
0x11e8   : > { %p2329_p5 = pnand %p2328_p3, %p2324_p0 }
0x1247   : > { %v1658_v34 = vpop.xlane.xlu2 %1657 }
0x1248   : > { %v1659_v35 = vmul.f32 %v1658_v34, %v2738_v42 }
0x124a   : > { %v1660_v36 = vadd.f32 1e-05, %v1659_v35 }
0x124c   : > { %2113 = vrsqrt.f32 %v1660_v36  ;;  %vm1667_vm4 = vweird.f32 %v1660_v36 }
0x1252   : > { %v2114_v37 = vpop.eup %2113 }
0x1253   : > { %v1662_v38 = vmul.f32 %v2114_v37, %v1660_v36  ;;  %vm1668_vm3 = vweird.f32 %v2114_v37 }
0x1254   : > { %vm1669_vm5 = vmor %vm1667_vm4, %vm1668_vm3 }
0x1255   : > { %v1663_v39 = vmul.f32 %v2114_v37, %v1662_v38 }
0x1257   : > { %v1664_v43 = vmul.f32 0.5, %v1663_v39 }
0x1259   : > { %v1665_v44 = vsub.f32 1.5, %v1664_v43 }
0x125b   : > { %v1666_v45 = vmul.f32 %v2114_v37, %v1665_v44 }
0x125d   : > { %v1670_v42 = vsel %vm1669_vm5, %v2114_v37, %v1666_v45 }
0x125e   : > { %v1671_v15 = vmul.f32 %v1670_v42, %v1654_v31 }
0x1260   : > { %v1675_v47 = vmul.f32 %v2071_v41, %v1671_v15 }
0x1262   : > { %v1679_v48 = vadd.f32 %v2072_v46, %v1675_v47 }
0x1264   : > { %1680 = vst.msk [vmem:[%s2641_s3] sm:$0xff] %vm598_vm1, %v1679_v48 }
0x1265   : > { %2332 = shalt.err (!%p2329_p5)
}
0x1266   : > { %1973 = dma.vmem_to_hbm [thread:$0]  (%p2578_p4), %s1700_s28, 128, %s1702_s2, %s1682_s17  }
0x1267 PF: > { %s1730_s3 = sand.u32 1, %s2373_s22   ;;  %p3067_p12 = scmp.ge.s32.totalorder %s2385_s0, 2 }
0x1268   : > { %s1731_s27 = scalar_lea.sflag [#allocation6], %s1730_s3 }
0x1269   : > { %p1995_p7 = pnand %p3067_p12, %p2582_p6 }
0x126b   : > { %p1996_p8 = pneg %p1995_p7 }
0x126d   : > { %2364 = dma.done.wait (%p1996_p8), %s1731_s27, 128  }
0x126e   : > { %2366 = vsyncadd (%p1996_p8), %s1731_s27, 4294967168  ;;  %s1741_s19 = scalar_lea.sflag [#allocation15], %s1730_s3 }
0x126f   : > { %2368 = dma.done.wait (%p1996_p8), %s1741_s19, 1024  }
0x1270   : > { %2370 = vsyncadd (%p1996_p8), %s1741_s19, 4294966272  ;;  %s3068_s0 = sld [smem:[#allocation23_spill]]  ;;  %s3071_s22 = smov %s2377_s23 }
0x1271   : > { %s3069_s4 = sld [smem:[#allocation22_spill]] }
0x1272   : > { %s3070_s24 = sld [smem:[#allocation24_spill]] }
0x1276   : > { %p42_p4 = scmp.ge.s32.totalorder %s3068_s0, 4  }
0x1277   : > { %s3072_s23 = smov %s3069_s4 }
0x1278   :  { %44 = sbr.rel (!%p42_p4) target bundleno = 20 (0x14), region = 165 }
0x127d   :  { %1747 = vsyncpa [#allocation5], 1 }
0x127e   :  { %1749 = vsyncpa [#allocation5 + $0x1], 1 }
0x127f   :  { %1750 = vsyncpa [#allocation8], 1 }
0x1280   :  { %1751 = vsyncpa [#allocation11], 1 }
0x1281   :  { %1752 = vsyncpa [#allocation6], 1 }
0x1282   :  { %1754 = vsyncpa [#allocation6 + $0x1], 1 }
0x1283   :  { %1755 = vsyncpa [#allocation15], 1 }
0x1284   :  { %1757 = vsyncpa [#allocation15 + $0x1], 1 }

</bundles_post_ra>
